<compile_context>
chip_gen: v7x
topology: tpu7x:2x2x1
jax: 0.10.0
libtpu: 0.0.40
codegen_flags: <defaults>
</compile_context>

<pallas_src>
import numpy as np

import jax
import jax.numpy as jnp
from jax import lax
from jax.experimental import pallas as pl
from jax.experimental.pallas import tpu as pltpu


def _round_up(v, m):
    return (v + m - 1) // m * m


# Tap order t = ky*3 + kx for the 3x3 kernel; source offset (oy, ox) = (ky-1, kx-1).
_TAP_OFFSETS = tuple((oy, ox) for oy in (-1, 0, 1) for ox in (-1, 0, 1))


# ----------------------------------------------------------------------------
# Fused dense-block kernel (one batch block per grid step).
# ----------------------------------------------------------------------------
def _make_block_kernel(num_layers, cin_pad, g_pad, W_img, hw_pad, batch_block):
    lanes = batch_block * hw_pad

    def kernel(x_ref, m_ref, w_ref, b_ref, o_ref, cache_ref):
        # x_ref     : (cin_pad, lanes)              fused-batch input channels
        # m_ref     : (9, lanes)                    per-tap boundary masks
        # w_ref     : (L*g_pad, K_max)              packed cache-order weights
        # b_ref     : (L*g_pad, 1)                  packed biases
        # o_ref     : (batch_block, L*g_pad, hw_pad) layer outputs (NCHW layout)
        # cache_ref : (K_max, lanes)                persistent im2col tap cache

        # ---- taps of the input channels: rolled + masked exactly once ----
        x = x_ref[...]
        for t, (oy, ox) in enumerate(_TAP_OFFSETS):
            s = oy * W_img + ox
            row0 = t * cin_pad
            if s == 0:
                cache_ref[row0:row0 + cin_pad, :] = x
            else:
                v = pltpu.roll(x, shift=(-s) % lanes, axis=1)
                cache_ref[row0:row0 + cin_pad, :] = v * m_ref[t:t + 1, :]

        # ---- hoist the (1,lanes)->(g_pad,lanes) mask broadcasts out of the
        #      layer loop (JAX does not CSE broadcast_in_dim) ----------------
        m_g = {}
        if num_layers > 1:
            for t, (oy, ox) in enumerate(_TAP_OFFSETS):
                if oy * W_img + ox != 0:
                    m_g[t] = jnp.broadcast_to(m_ref[t:t + 1, :], (g_pad, lanes))

        # ---- dense layers: one contiguous MXU contraction each ------------
        for i in range(num_layers):
            k_i = 9 * (cin_pad + i * g_pad)          # contraction size
            w_i = w_ref[i * g_pad:(i + 1) * g_pad, 0:k_i]
            b_i = b_ref[i * g_pad:(i + 1) * g_pad, :]

            acc = jnp.dot(w_i, cache_ref[0:k_i, :],
                          preferred_element_type=jnp.float32)
            out = jnp.maximum(acc + b_i, 0.0)        # (g_pad, lanes)

            # Lane-dense per-image stores -> output already in NCHW layout.
            for b in range(batch_block):
                o_ref[b, i * g_pad:(i + 1) * g_pad, :] = (
                    out[:, b * hw_pad:(b + 1) * hw_pad].astype(o_ref.dtype))

            # Cache the 9 taps of the NEW channels only (skip after last layer).
            if i < num_layers - 1:
                base = k_i
                for t, (oy, ox) in enumerate(_TAP_OFFSETS):
                    s = oy * W_img + ox
                    row0 = base + t * g_pad
                    if s == 0:
                        cache_ref[row0:row0 + g_pad, :] = out
                    else:
                        v = pltpu.roll(out, shift=(-s) % lanes, axis=1)
                        cache_ref[row0:row0 + g_pad, :] = v * m_g[t]

    return kernel


# ----------------------------------------------------------------------------
# PartialDenseBlock wrapper (NCHW in / NCHW out, like the PyTorch module).
# ----------------------------------------------------------------------------
class PartialDenseBlockPallas:
    def __init__(self, in_channels, growth_rate, num_layers, key):
        self.in_channels = in_channels
        self.growth_rate = growth_rate
        self.num_layers = num_layers

        # Original (unpadded) parameters -- also used by the pure-JAX reference.
        self.params = []
        for i in range(num_layers):
            cin = in_channels + i * growth_rate
            key, kw, kb = jax.random.split(key, 3)
            w = (jax.random.normal(kw, (3, 3, cin, growth_rate), jnp.float32)
                 * (2.0 / (9.0 * cin)) ** 0.5)
            b = jax.random.normal(kb, (growth_rate,), jnp.float32) * 0.01
            self.params.append((w, b))

        # Channel segments padded to multiples of 8 -> tile-aligned sublane slices.
        self.cin_pad = _round_up(in_channels, 8)
        self.g_pad = _round_up(growth_rate, 8)
        # Tap-cache rows: input segment + one segment per layer that feeds a
        # later layer (the last layer's outputs are never consumed).
        self.K_max = 9 * (self.cin_pad + (num_layers - 1) * self.g_pad)

        # Pack ALL layer weights into one slab (L*g_pad, K_max), columns ordered
        # to match the tap-cache row layout:
        #   input channel c, tap t      -> row t*cin_pad + c
        #   layer k output r, tap t     -> row 9*cin_pad + k*9*g_pad + t*g_pad + r
        W_all = np.zeros((num_layers * self.g_pad, self.K_max), np.float32)
        b_all = np.zeros((num_layers * self.g_pad, 1), np.float32)
        g = growth_rate
        for i, (w, b) in enumerate(self.params):
            w_np = np.asarray(w)                      # (3, 3, cin_real, g)
            rows = slice(i * self.g_pad, i * self.g_pad + g)
            b_all[i * self.g_pad:i * self.g_pad + g, 0] = np.asarray(b)
            for t, (oy, ox) in enumerate(_TAP_OFFSETS):
                ky, kx = oy + 1, ox + 1
                cols = t * self.cin_pad + np.arange(in_channels)
                W_all[rows, cols] = w_np[ky, kx, :in_channels, :].T
                for k in range(i):
                    src = w_np[ky, kx,
                               in_channels + k * g:in_channels + (k + 1) * g, :]
                    cols = (9 * self.cin_pad + k * 9 * self.g_pad
                            + t * self.g_pad + np.arange(g))
                    W_all[rows, cols] = src.T
        self.w_all = jnp.asarray(W_all)
        self.b_all = jnp.asarray(b_all)

    # How many batch elements to fuse onto the lane axis per grid step
    # (largest divisor of N that fits the VMEM budget).
    def _pick_batch_block(self, N, hw_pad, budget_bytes=48 << 20):
        per_b = 4 * hw_pad * (
            2 * self.cin_pad                          # input block, double-buffered
            + 2 * self.num_layers * self.g_pad        # output block, double-buffered
            + self.K_max                              # tap cache
            + 9 * max(self.cin_pad, self.g_pad)       # rolled-tap temporaries
            + 10 * self.g_pad + 9)                    # layer output + masks
        fixed = 4 * (int(self.w_all.size) + int(self.b_all.size))
        max_b = max(1, int((budget_bytes - fixed) // per_b))
        b = min(N, max_b)
        while N % b:
            b -= 1
        return b

    def __call__(self, x_nchw):
        N, C, H, W = x_nchw.shape
        assert C == self.in_channels
        HW = H * W
        hw_pad = _round_up(HW, 128)                   # lane-dense stores
        L, g = self.num_layers, self.growth_rate
        g_pad, cin_pad, K_max = self.g_pad, self.cin_pad, self.K_max

        batch_block = self._pick_batch_block(N, hw_pad)
        lanes = batch_block * hw_pad

        # Fused-batch, channel-major input slab: (cin_pad, N*hw_pad).
        xf = x_nchw.reshape(N, C, HW).astype(jnp.float32)
        xf = jnp.pad(xf, ((0, 0), (0, cin_pad - C), (0, hw_pad - HW)))
        xf = jnp.transpose(xf, (1, 0, 2)).reshape(cin_pad, N * hw_pad)

        # Per-tap boundary-validity masks (replace zero padding), tiled over
        # the fused batch block; pad lanes are masked to 0.
        ys, xs = np.meshgrid(np.arange(H), np.arange(W), indexing="ij")
        ys = ys.reshape(-1)
        xs = xs.reshape(-1)
        m = np.zeros((9, hw_pad), np.float32)
        for t, (oy, ox) in enumerate(_TAP_OFFSETS):
            m[t, :HW] = ((ys + oy >= 0) & (ys + oy < H) &
                         (xs + ox >= 0) & (xs + ox < W))
        masks = jnp.asarray(np.tile(m, (1, batch_block)))

        kernel = _make_block_kernel(L, cin_pad, g_pad, W, hw_pad, batch_block)

        # Advisory cost + explicit VMEM budget from the computed tile sizes.
        flops = int(sum(2 * g_pad * 9 * (cin_pad + i * g_pad) * N * hw_pad
                        for i in range(L)))
        bytes_accessed = int(4 * (xf.size + masks.size + self.w_all.size
                                  + self.b_all.size + N * L * g_pad * hw_pad))
        vmem_est = 4 * (2 * cin_pad * lanes
                        + int(masks.size)
                        + int(self.w_all.size) + int(self.b_all.size)
                        + 2 * L * g_pad * lanes
                        + K_max * lanes
                        + (9 * max(cin_pad, g_pad) + 10 * g_pad) * lanes)
        vmem_limit = int(min(100 << 20, max(32 << 20, 2 * vmem_est)))

        out = pl.pallas_call(
            kernel,
            grid=(N // batch_block,),
            in_specs=[
                pl.BlockSpec((cin_pad, lanes), lambda n: (0, n)),
                pl.BlockSpec((9, lanes), lambda n: (0, 0)),
                pl.BlockSpec(self.w_all.shape, lambda n: (0, 0)),
                pl.BlockSpec(self.b_all.shape, lambda n: (0, 0)),
            ],
            out_specs=pl.BlockSpec((batch_block, L * g_pad, hw_pad),
                                   lambda n: (n, 0, 0)),
            out_shape=jax.ShapeDtypeStruct((N, L * g_pad, hw_pad), jnp.float32),
            scratch_shapes=[pltpu.VMEM((K_max, lanes), jnp.float32)],
            compiler_params=pltpu.CompilerParams(
                dimension_semantics=("parallel",),
                vmem_limit_bytes=vmem_limit),
            cost_estimate=pl.CostEstimate(flops=flops, transcendentals=0,
                                          bytes_accessed=bytes_accessed),
        )(xf, masks, self.w_all, self.b_all)

        # Drop lane / growth padding with contiguous slices (no gather), then
        # prepend the input channels (the torch block returns cat([x, outs])).
        out = out[:, :, :HW]
        if g_pad != g:
            out = out.reshape(N, L, g_pad, HW)[:, :, :g, :].reshape(N, L * g, HW)
        y = jnp.concatenate(
            [x_nchw.reshape(N, C, HW).astype(out.dtype), out], axis=1)
        return y.reshape(N, C + L * g, H, W)


# ----------------------------------------------------------------------------
# Pure-JAX reference for correctness checking.
# ----------------------------------------------------------------------------
def _ref_block(x_nchw, params):
    x = jnp.transpose(x_nchw, (0, 2, 3, 1))                    # NCHW -> NHWC
    features = [x]
    for w, b in params:
        inp = jnp.concatenate(features, axis=-1)
        out = lax.conv_general_dilated(
            inp, w, window_strides=(1, 1), padding="SAME",
            dimension_numbers=("NHWC", "HWIO", "NHWC"))
        out = jnp.maximum(out + b[None, None, None, :], 0.0)
        features.append(out)
    y = jnp.concatenate(features, axis=-1)
    return jnp.transpose(y, (0, 3, 1, 2))                      # NHWC -> NCHW


if __name__ == "__main__":
    key = jax.random.PRNGKey(0)
    k_x, k_p = jax.random.split(key)

    N, C, H, W = 2, 4, 16, 16
    growth_rate, num_layers = 8, 3

    x = jax.random.normal(k_x, (N, C, H, W), jnp.float32)      # NCHW input
    block = PartialDenseBlockPallas(C, growth_rate, num_layers, k_p)

    y = jax.block_until_ready(block(x))

    expected_channels = C + growth_rate * num_layers
    assert y.shape == (N, expected_channels, H, W), y.shape

    y_ref = _ref_block(x, block.params)
    max_err = float(jnp.max(jnp.abs(y - y_ref)))
    assert jnp.allclose(y, y_ref, atol=1e-4, rtol=1e-4), max_err

    print("KERNEL_OK")
</pallas_src>

<mosaic_0001>
module attributes {stable_mosaic.version = 11 : i64} {
  func.func @kernel(%arg0: i32, %arg1: memref<8x512xf32, #tpu.memory_space<vmem>>, %arg2: memref<9x512xf32, #tpu.memory_space<vmem>>, %arg3: memref<24x216xf32, #tpu.memory_space<vmem>>, %arg4: memref<24x1xf32, #tpu.memory_space<vmem>>, %arg5: memref<2x24x256xf32, #tpu.memory_space<vmem>>, %arg6: memref<216x512xf32, #tpu.memory_space<vmem>>) attributes {dimension_semantics = [#tpu.dimension_semantics<parallel>], iteration_bounds = array<i64: 1>, scalar_prefetch = 0 : i64, scratch_operands = 1 : i64, tpu.core_type = #tpu.core_type<tc>, window_params = [{transform_indices = @transform_0, window_bounds = array<i64: 8, 512>}, {pipeline_mode = #tpu.pipeline_mode<synchronous>, transform_indices = @transform_1, window_bounds = array<i64: 9, 512>}, {pipeline_mode = #tpu.pipeline_mode<synchronous>, transform_indices = @transform_2, window_bounds = array<i64: 24, 216>}, {pipeline_mode = #tpu.pipeline_mode<synchronous>, transform_indices = @transform_3, window_bounds = array<i64: 24, 1>}, {transform_indices = @transform_4, window_bounds = array<i64: 2, 24, 256>}]} {
    %c0 = arith.constant 0 : index
    %c0_0 = arith.constant 0 : index
    %0 = vector.load %arg1[%c0, %c0_0] : memref<8x512xf32, #tpu.memory_space<vmem>>, vector<8x512xf32>
    %c17_i32 = arith.constant 17 : i32
    %1 = tpu.dynamic_rotate %0 by %c17_i32 dim 1 : vector<8x512xf32>, i32 -> vector<8x512xf32>
    %c0_1 = arith.constant 0 : index
    %c0_2 = arith.constant 0 : index
    %2 = vector.load %arg2[%c0_1, %c0_2] : memref<9x512xf32, #tpu.memory_space<vmem>>, vector<1x512xf32>
    %3 = vector.broadcast %2 : vector<1x512xf32> to vector<8x512xf32>
    %4 = arith.mulf %1, %3 : vector<8x512xf32>
    %c0_3 = arith.constant 0 : index
    %c0_4 = arith.constant 0 : index
    %5 = vector.load %arg6[%c0_3, %c0_4] : memref<216x512xf32, #tpu.memory_space<vmem>>, vector<8x512xf32>
    tpu.vector_store %arg6[%c0_3, %c0_4], %4 {strides = array<i32>} : memref<216x512xf32, #tpu.memory_space<vmem>>, vector<8x512xf32>,
    %c16_i32 = arith.constant 16 : i32
    %6 = tpu.dynamic_rotate %0 by %c16_i32 dim 1 : vector<8x512xf32>, i32 -> vector<8x512xf32>
    %c1 = arith.constant 1 : index
    %c0_5 = arith.constant 0 : index
    %7 = vector.load %arg2[%c1, %c0_5] : memref<9x512xf32, #tpu.memory_space<vmem>>, vector<1x512xf32>
    %8 = vector.broadcast %7 : vector<1x512xf32> to vector<8x512xf32>
    %9 = arith.mulf %6, %8 : vector<8x512xf32>
    %c8 = arith.constant 8 : index
    %c0_6 = arith.constant 0 : index
    %10 = vector.load %arg6[%c8, %c0_6] : memref<216x512xf32, #tpu.memory_space<vmem>>, vector<8x512xf32>
    tpu.vector_store %arg6[%c8, %c0_6], %9 {strides = array<i32>} : memref<216x512xf32, #tpu.memory_space<vmem>>, vector<8x512xf32>,
    %c15_i32 = arith.constant 15 : i32
    %11 = tpu.dynamic_rotate %0 by %c15_i32 dim 1 : vector<8x512xf32>, i32 -> vector<8x512xf32>
    %c2 = arith.constant 2 : index
    %c0_7 = arith.constant 0 : index
    %12 = vector.load %arg2[%c2, %c0_7] : memref<9x512xf32, #tpu.memory_space<vmem>>, vector<1x512xf32>
    %13 = vector.broadcast %12 : vector<1x512xf32> to vector<8x512xf32>
    %14 = arith.mulf %11, %13 : vector<8x512xf32>
    %c16 = arith.constant 16 : index
    %c0_8 = arith.constant 0 : index
    %15 = vector.load %arg6[%c16, %c0_8] : memref<216x512xf32, #tpu.memory_space<vmem>>, vector<8x512xf32>
    tpu.vector_store %arg6[%c16, %c0_8], %14 {strides = array<i32>} : memref<216x512xf32, #tpu.memory_space<vmem>>, vector<8x512xf32>,
    %c1_i32 = arith.constant 1 : i32
    %16 = tpu.dynamic_rotate %0 by %c1_i32 dim 1 : vector<8x512xf32>, i32 -> vector<8x512xf32>
    %c3 = arith.constant 3 : index
    %c0_9 = arith.constant 0 : index
    %17 = vector.load %arg2[%c3, %c0_9] : memref<9x512xf32, #tpu.memory_space<vmem>>, vector<1x512xf32>
    %18 = vector.broadcast %17 : vector<1x512xf32> to vector<8x512xf32>
    %19 = arith.mulf %16, %18 : vector<8x512xf32>
    %c24 = arith.constant 24 : index
    %c0_10 = arith.constant 0 : index
    %20 = vector.load %arg6[%c24, %c0_10] : memref<216x512xf32, #tpu.memory_space<vmem>>, vector<8x512xf32>
    tpu.vector_store %arg6[%c24, %c0_10], %19 {strides = array<i32>} : memref<216x512xf32, #tpu.memory_space<vmem>>, vector<8x512xf32>,
    %c32 = arith.constant 32 : index
    %c0_11 = arith.constant 0 : index
    %21 = vector.load %arg6[%c32, %c0_11] : memref<216x512xf32, #tpu.memory_space<vmem>>, vector<8x512xf32>
    tpu.vector_store %arg6[%c32, %c0_11], %0 {strides = array<i32>} : memref<216x512xf32, #tpu.memory_space<vmem>>, vector<8x512xf32>,
    %c511_i32 = arith.constant 511 : i32
    %22 = tpu.dynamic_rotate %0 by %c511_i32 dim 1 : vector<8x512xf32>, i32 -> vector<8x512xf32>
    %c5 = arith.constant 5 : index
    %c0_12 = arith.constant 0 : index
    %23 = vector.load %arg2[%c5, %c0_12] : memref<9x512xf32, #tpu.memory_space<vmem>>, vector<1x512xf32>
    %24 = vector.broadcast %23 : vector<1x512xf32> to vector<8x512xf32>
    %25 = arith.mulf %22, %24 : vector<8x512xf32>
    %c40 = arith.constant 40 : index
    %c0_13 = arith.constant 0 : index
    %26 = vector.load %arg6[%c40, %c0_13] : memref<216x512xf32, #tpu.memory_space<vmem>>, vector<8x512xf32>
    tpu.vector_store %arg6[%c40, %c0_13], %25 {strides = array<i32>} : memref<216x512xf32, #tpu.memory_space<vmem>>, vector<8x512xf32>,
    %c497_i32 = arith.constant 497 : i32
    %27 = tpu.dynamic_rotate %0 by %c497_i32 dim 1 : vector<8x512xf32>, i32 -> vector<8x512xf32>
    %c6 = arith.constant 6 : index
    %c0_14 = arith.constant 0 : index
    %28 = vector.load %arg2[%c6, %c0_14] : memref<9x512xf32, #tpu.memory_space<vmem>>, vector<1x512xf32>
    %29 = vector.broadcast %28 : vector<1x512xf32> to vector<8x512xf32>
    %30 = arith.mulf %27, %29 : vector<8x512xf32>
    %c48 = arith.constant 48 : index
    %c0_15 = arith.constant 0 : index
    %31 = vector.load %arg6[%c48, %c0_15] : memref<216x512xf32, #tpu.memory_space<vmem>>, vector<8x512xf32>
    tpu.vector_store %arg6[%c48, %c0_15], %30 {strides = array<i32>} : memref<216x512xf32, #tpu.memory_space<vmem>>, vector<8x512xf32>,
    %c496_i32 = arith.constant 496 : i32
    %32 = tpu.dynamic_rotate %0 by %c496_i32 dim 1 : vector<8x512xf32>, i32 -> vector<8x512xf32>
    %c7 = arith.constant 7 : index
    %c0_16 = arith.constant 0 : index
    %33 = vector.load %arg2[%c7, %c0_16] : memref<9x512xf32, #tpu.memory_space<vmem>>, vector<1x512xf32>
    %34 = vector.broadcast %33 : vector<1x512xf32> to vector<8x512xf32>
    %35 = arith.mulf %32, %34 : vector<8x512xf32>
    %c56 = arith.constant 56 : index
    %c0_17 = arith.constant 0 : index
    %36 = vector.load %arg6[%c56, %c0_17] : memref<216x512xf32, #tpu.memory_space<vmem>>, vector<8x512xf32>
    tpu.vector_store %arg6[%c56, %c0_17], %35 {strides = array<i32>} : memref<216x512xf32, #tpu.memory_space<vmem>>, vector<8x512xf32>,
    %c495_i32 = arith.constant 495 : i32
    %37 = tpu.dynamic_rotate %0 by %c495_i32 dim 1 : vector<8x512xf32>, i32 -> vector<8x512xf32>
    %c8_18 = arith.constant 8 : index
    %c0_19 = arith.constant 0 : index
    %38 = vector.load %arg2[%c8_18, %c0_19] : memref<9x512xf32, #tpu.memory_space<vmem>>, vector<1x512xf32>
    %39 = vector.broadcast %38 : vector<1x512xf32> to vector<8x512xf32>
    %40 = arith.mulf %37, %39 : vector<8x512xf32>
    %c64 = arith.constant 64 : index
    %c0_20 = arith.constant 0 : index
    %41 = vector.load %arg6[%c64, %c0_20] : memref<216x512xf32, #tpu.memory_space<vmem>>, vector<8x512xf32>
    tpu.vector_store %arg6[%c64, %c0_20], %40 {strides = array<i32>} : memref<216x512xf32, #tpu.memory_space<vmem>>, vector<8x512xf32>,
    %c0_21 = arith.constant 0 : index
    %c0_22 = arith.constant 0 : index
    %42 = vector.load %arg2[%c0_21, %c0_22] : memref<9x512xf32, #tpu.memory_space<vmem>>, vector<1x512xf32>
    %43 = vector.shape_cast %42 : vector<1x512xf32> to vector<1x512xf32>
    %44 = vector.broadcast %43 : vector<1x512xf32> to vector<8x512xf32>
    %c1_23 = arith.constant 1 : index
    %c0_24 = arith.constant 0 : index
    %45 = vector.load %arg2[%c1_23, %c0_24] : memref<9x512xf32, #tpu.memory_space<vmem>>, vector<1x512xf32>
    %46 = vector.shape_cast %45 : vector<1x512xf32> to vector<1x512xf32>
    %47 = vector.broadcast %46 : vector<1x512xf32> to vector<8x512xf32>
    %c2_25 = arith.constant 2 : index
    %c0_26 = arith.constant 0 : index
    %48 = vector.load %arg2[%c2_25, %c0_26] : memref<9x512xf32, #tpu.memory_space<vmem>>, vector<1x512xf32>
    %49 = vector.shape_cast %48 : vector<1x512xf32> to vector<1x512xf32>
    %50 = vector.broadcast %49 : vector<1x512xf32> to vector<8x512xf32>
    %c3_27 = arith.constant 3 : index
    %c0_28 = arith.constant 0 : index
    %51 = vector.load %arg2[%c3_27, %c0_28] : memref<9x512xf32, #tpu.memory_space<vmem>>, vector<1x512xf32>
    %52 = vector.shape_cast %51 : vector<1x512xf32> to vector<1x512xf32>
    %53 = vector.broadcast %52 : vector<1x512xf32> to vector<8x512xf32>
    %c5_29 = arith.constant 5 : index
    %c0_30 = arith.constant 0 : index
    %54 = vector.load %arg2[%c5_29, %c0_30] : memref<9x512xf32, #tpu.memory_space<vmem>>, vector<1x512xf32>
    %55 = vector.shape_cast %54 : vector<1x512xf32> to vector<1x512xf32>
    %56 = vector.broadcast %55 : vector<1x512xf32> to vector<8x512xf32>
    %c6_31 = arith.constant 6 : index
    %c0_32 = arith.constant 0 : index
    %57 = vector.load %arg2[%c6_31, %c0_32] : memref<9x512xf32, #tpu.memory_space<vmem>>, vector<1x512xf32>
    %58 = vector.shape_cast %57 : vector<1x512xf32> to vector<1x512xf32>
    %59 = vector.broadcast %58 : vector<1x512xf32> to vector<8x512xf32>
    %c7_33 = arith.constant 7 : index
    %c0_34 = arith.constant 0 : index
    %60 = vector.load %arg2[%c7_33, %c0_34] : memref<9x512xf32, #tpu.memory_space<vmem>>, vector<1x512xf32>
    %61 = vector.shape_cast %60 : vector<1x512xf32> to vector<1x512xf32>
    %62 = vector.broadcast %61 : vector<1x512xf32> to vector<8x512xf32>
    %c8_35 = arith.constant 8 : index
    %c0_36 = arith.constant 0 : index
    %63 = vector.load %arg2[%c8_35, %c0_36] : memref<9x512xf32, #tpu.memory_space<vmem>>, vector<1x512xf32>
    %64 = vector.shape_cast %63 : vector<1x512xf32> to vector<1x512xf32>
    %65 = vector.broadcast %64 : vector<1x512xf32> to vector<8x512xf32>
    %c0_37 = arith.constant 0 : index
    %c0_38 = arith.constant 0 : index
    %66 = vector.load %arg3[%c0_37, %c0_38] : memref<24x216xf32, #tpu.memory_space<vmem>>, vector<8x72xf32>
    %c0_39 = arith.constant 0 : index
    %c0_40 = arith.constant 0 : index
    %67 = vector.load %arg4[%c0_39, %c0_40] : memref<24x1xf32, #tpu.memory_space<vmem>>, vector<8x1xf32>
    %c0_41 = arith.constant 0 : index
    %c0_42 = arith.constant 0 : index
    %68 = vector.load %arg6[%c0_41, %c0_42] : memref<216x512xf32, #tpu.memory_space<vmem>>, vector<72x512xf32>
    %cst = arith.constant dense<0.000000e+00> : vector<8x512xf32>
    %69 = tpu.matmul %66, %68, %cst {dimension_numbers = #tpu.dot_dimension_numbers<[1], [0], [0], [1], [0, 0, 1, 1], [], []>} : vector<8x72xf32>, vector<72x512xf32>, vector<8x512xf32> -> vector<8x512xf32>
    %70 = vector.broadcast %67 : vector<8x1xf32> to vector<8x512xf32>
    %71 = arith.addf %69, %70 : vector<8x512xf32>
    %cst_43 = arith.constant 0.000000e+00 : f32
    %72 = vector.broadcast %cst_43 : f32 to vector<8x512xf32>
    %73 = arith.maximumf %71, %72 : vector<8x512xf32>
    %74 = vector.extract_strided_slice %73 {offsets = [0, 0], sizes = [8, 256], strides = [1, 1]} : vector<8x512xf32> to vector<8x256xf32>
    %c0_44 = arith.constant 0 : index
    %c0_45 = arith.constant 0 : index
    %c0_46 = arith.constant 0 : index
    %75 = vector.load %arg5[%c0_44, %c0_45, %c0_46] : memref<2x24x256xf32, #tpu.memory_space<vmem>>, vector<1x8x256xf32>
    %76 = vector.shape_cast %75 : vector<1x8x256xf32> to vector<8x256xf32>
    %77 = vector.shape_cast %74 : vector<8x256xf32> to vector<1x8x256xf32>
    tpu.vector_store %arg5[%c0_44, %c0_45, %c0_46], %77 {strides = array<i32>} : memref<2x24x256xf32, #tpu.memory_space<vmem>>, vector<1x8x256xf32>,
    %78 = vector.extract_strided_slice %73 {offsets = [0, 256], sizes = [8, 256], strides = [1, 1]} : vector<8x512xf32> to vector<8x256xf32>
    %c1_47 = arith.constant 1 : index
    %c0_48 = arith.constant 0 : index
    %c0_49 = arith.constant 0 : index
    %79 = vector.load %arg5[%c1_47, %c0_48, %c0_49] : memref<2x24x256xf32, #tpu.memory_space<vmem>>, vector<1x8x256xf32>
    %80 = vector.shape_cast %79 : vector<1x8x256xf32> to vector<8x256xf32>
    %81 = vector.shape_cast %78 : vector<8x256xf32> to vector<1x8x256xf32>
    tpu.vector_store %arg5[%c1_47, %c0_48, %c0_49], %81 {strides = array<i32>} : memref<2x24x256xf32, #tpu.memory_space<vmem>>, vector<1x8x256xf32>,
    %c17_i32_50 = arith.constant 17 : i32
    %82 = tpu.dynamic_rotate %73 by %c17_i32_50 dim 1 : vector<8x512xf32>, i32 -> vector<8x512xf32>
    %83 = arith.mulf %82, %44 : vector<8x512xf32>
    %c72 = arith.constant 72 : index
    %c0_51 = arith.constant 0 : index
    %84 = vector.load %arg6[%c72, %c0_51] : memref<216x512xf32, #tpu.memory_space<vmem>>, vector<8x512xf32>
    tpu.vector_store %arg6[%c72, %c0_51], %83 {strides = array<i32>} : memref<216x512xf32, #tpu.memory_space<vmem>>, vector<8x512xf32>,
    %c16_i32_52 = arith.constant 16 : i32
    %85 = tpu.dynamic_rotate %73 by %c16_i32_52 dim 1 : vector<8x512xf32>, i32 -> vector<8x512xf32>
    %86 = arith.mulf %85, %47 : vector<8x512xf32>
    %c80 = arith.constant 80 : index
    %c0_53 = arith.constant 0 : index
    %87 = vector.load %arg6[%c80, %c0_53] : memref<216x512xf32, #tpu.memory_space<vmem>>, vector<8x512xf32>
    tpu.vector_store %arg6[%c80, %c0_53], %86 {strides = array<i32>} : memref<216x512xf32, #tpu.memory_space<vmem>>, vector<8x512xf32>,
    %c15_i32_54 = arith.constant 15 : i32
    %88 = tpu.dynamic_rotate %73 by %c15_i32_54 dim 1 : vector<8x512xf32>, i32 -> vector<8x512xf32>
    %89 = arith.mulf %88, %50 : vector<8x512xf32>
    %c88 = arith.constant 88 : index
    %c0_55 = arith.constant 0 : index
    %90 = vector.load %arg6[%c88, %c0_55] : memref<216x512xf32, #tpu.memory_space<vmem>>, vector<8x512xf32>
    tpu.vector_store %arg6[%c88, %c0_55], %89 {strides = array<i32>} : memref<216x512xf32, #tpu.memory_space<vmem>>, vector<8x512xf32>,
    %c1_i32_56 = arith.constant 1 : i32
    %91 = tpu.dynamic_rotate %73 by %c1_i32_56 dim 1 : vector<8x512xf32>, i32 -> vector<8x512xf32>
    %92 = arith.mulf %91, %53 : vector<8x512xf32>
    %c96 = arith.constant 96 : index
    %c0_57 = arith.constant 0 : index
    %93 = vector.load %arg6[%c96, %c0_57] : memref<216x512xf32, #tpu.memory_space<vmem>>, vector<8x512xf32>
    tpu.vector_store %arg6[%c96, %c0_57], %92 {strides = array<i32>} : memref<216x512xf32, #tpu.memory_space<vmem>>, vector<8x512xf32>,
    %c104 = arith.constant 104 : index
    %c0_58 = arith.constant 0 : index
    %94 = vector.load %arg6[%c104, %c0_58] : memref<216x512xf32, #tpu.memory_space<vmem>>, vector<8x512xf32>
    tpu.vector_store %arg6[%c104, %c0_58], %73 {strides = array<i32>} : memref<216x512xf32, #tpu.memory_space<vmem>>, vector<8x512xf32>,
    %c511_i32_59 = arith.constant 511 : i32
    %95 = tpu.dynamic_rotate %73 by %c511_i32_59 dim 1 : vector<8x512xf32>, i32 -> vector<8x512xf32>
    %96 = arith.mulf %95, %56 : vector<8x512xf32>
    %c112 = arith.constant 112 : index
    %c0_60 = arith.constant 0 : index
    %97 = vector.load %arg6[%c112, %c0_60] : memref<216x512xf32, #tpu.memory_space<vmem>>, vector<8x512xf32>
    tpu.vector_store %arg6[%c112, %c0_60], %96 {strides = array<i32>} : memref<216x512xf32, #tpu.memory_space<vmem>>, vector<8x512xf32>,
    %c497_i32_61 = arith.constant 497 : i32
    %98 = tpu.dynamic_rotate %73 by %c497_i32_61 dim 1 : vector<8x512xf32>, i32 -> vector<8x512xf32>
    %99 = arith.mulf %98, %59 : vector<8x512xf32>
    %c120 = arith.constant 120 : index
    %c0_62 = arith.constant 0 : index
    %100 = vector.load %arg6[%c120, %c0_62] : memref<216x512xf32, #tpu.memory_space<vmem>>, vector<8x512xf32>
    tpu.vector_store %arg6[%c120, %c0_62], %99 {strides = array<i32>} : memref<216x512xf32, #tpu.memory_space<vmem>>, vector<8x512xf32>,
    %c496_i32_63 = arith.constant 496 : i32
    %101 = tpu.dynamic_rotate %73 by %c496_i32_63 dim 1 : vector<8x512xf32>, i32 -> vector<8x512xf32>
    %102 = arith.mulf %101, %62 : vector<8x512xf32>
    %c128 = arith.constant 128 : index
    %c0_64 = arith.constant 0 : index
    %103 = vector.load %arg6[%c128, %c0_64] : memref<216x512xf32, #tpu.memory_space<vmem>>, vector<8x512xf32>
    tpu.vector_store %arg6[%c128, %c0_64], %102 {strides = array<i32>} : memref<216x512xf32, #tpu.memory_space<vmem>>, vector<8x512xf32>,
    %c495_i32_65 = arith.constant 495 : i32
    %104 = tpu.dynamic_rotate %73 by %c495_i32_65 dim 1 : vector<8x512xf32>, i32 -> vector<8x512xf32>
    %105 = arith.mulf %104, %65 : vector<8x512xf32>
    %c136 = arith.constant 136 : index
    %c0_66 = arith.constant 0 : index
    %106 = vector.load %arg6[%c136, %c0_66] : memref<216x512xf32, #tpu.memory_space<vmem>>, vector<8x512xf32>
    tpu.vector_store %arg6[%c136, %c0_66], %105 {strides = array<i32>} : memref<216x512xf32, #tpu.memory_space<vmem>>, vector<8x512xf32>,
    %c8_67 = arith.constant 8 : index
    %c0_68 = arith.constant 0 : index
    %107 = vector.load %arg3[%c8_67, %c0_68] : memref<24x216xf32, #tpu.memory_space<vmem>>, vector<8x144xf32>
    %c8_69 = arith.constant 8 : index
    %c0_70 = arith.constant 0 : index
    %108 = vector.load %arg4[%c8_69, %c0_70] : memref<24x1xf32, #tpu.memory_space<vmem>>, vector<8x1xf32>
    %c0_71 = arith.constant 0 : index
    %c0_72 = arith.constant 0 : index
    %109 = vector.load %arg6[%c0_71, %c0_72] : memref<216x512xf32, #tpu.memory_space<vmem>>, vector<144x512xf32>
    %cst_73 = arith.constant dense<0.000000e+00> : vector<8x512xf32>
    %110 = tpu.matmul %107, %109, %cst_73 {dimension_numbers = #tpu.dot_dimension_numbers<[1], [0], [0], [1], [0, 0, 1, 1], [], []>} : vector<8x144xf32>, vector<144x512xf32>, vector<8x512xf32> -> vector<8x512xf32>
    %111 = vector.broadcast %108 : vector<8x1xf32> to vector<8x512xf32>
    %112 = arith.addf %110, %111 : vector<8x512xf32>
    %cst_74 = arith.constant 0.000000e+00 : f32
    %113 = vector.broadcast %cst_74 : f32 to vector<8x512xf32>
    %114 = arith.maximumf %112, %113 : vector<8x512xf32>
    %115 = vector.extract_strided_slice %114 {offsets = [0, 0], sizes = [8, 256], strides = [1, 1]} : vector<8x512xf32> to vector<8x256xf32>
    %c0_75 = arith.constant 0 : index
    %c8_76 = arith.constant 8 : index
    %c0_77 = arith.constant 0 : index
    %116 = vector.load %arg5[%c0_75, %c8_76, %c0_77] : memref<2x24x256xf32, #tpu.memory_space<vmem>>, vector<1x8x256xf32>
    %117 = vector.shape_cast %116 : vector<1x8x256xf32> to vector<8x256xf32>
    %118 = vector.shape_cast %115 : vector<8x256xf32> to vector<1x8x256xf32>
    tpu.vector_store %arg5[%c0_75, %c8_76, %c0_77], %118 {strides = array<i32>} : memref<2x24x256xf32, #tpu.memory_space<vmem>>, vector<1x8x256xf32>,
    %119 = vector.extract_strided_slice %114 {offsets = [0, 256], sizes = [8, 256], strides = [1, 1]} : vector<8x512xf32> to vector<8x256xf32>
    %c1_78 = arith.constant 1 : index
    %c8_79 = arith.constant 8 : index
    %c0_80 = arith.constant 0 : index
    %120 = vector.load %arg5[%c1_78, %c8_79, %c0_80] : memref<2x24x256xf32, #tpu.memory_space<vmem>>, vector<1x8x256xf32>
    %121 = vector.shape_cast %120 : vector<1x8x256xf32> to vector<8x256xf32>
    %122 = vector.shape_cast %119 : vector<8x256xf32> to vector<1x8x256xf32>
    tpu.vector_store %arg5[%c1_78, %c8_79, %c0_80], %122 {strides = array<i32>} : memref<2x24x256xf32, #tpu.memory_space<vmem>>, vector<1x8x256xf32>,
    %c17_i32_81 = arith.constant 17 : i32
    %123 = tpu.dynamic_rotate %114 by %c17_i32_81 dim 1 : vector<8x512xf32>, i32 -> vector<8x512xf32>
    %124 = arith.mulf %123, %44 : vector<8x512xf32>
    %c144 = arith.constant 144 : index
    %c0_82 = arith.constant 0 : index
    %125 = vector.load %arg6[%c144, %c0_82] : memref<216x512xf32, #tpu.memory_space<vmem>>, vector<8x512xf32>
    tpu.vector_store %arg6[%c144, %c0_82], %124 {strides = array<i32>} : memref<216x512xf32, #tpu.memory_space<vmem>>, vector<8x512xf32>,
    %c16_i32_83 = arith.constant 16 : i32
    %126 = tpu.dynamic_rotate %114 by %c16_i32_83 dim 1 : vector<8x512xf32>, i32 -> vector<8x512xf32>
    %127 = arith.mulf %126, %47 : vector<8x512xf32>
    %c152 = arith.constant 152 : index
    %c0_84 = arith.constant 0 : index
    %128 = vector.load %arg6[%c152, %c0_84] : memref<216x512xf32, #tpu.memory_space<vmem>>, vector<8x512xf32>
    tpu.vector_store %arg6[%c152, %c0_84], %127 {strides = array<i32>} : memref<216x512xf32, #tpu.memory_space<vmem>>, vector<8x512xf32>,
    %c15_i32_85 = arith.constant 15 : i32
    %129 = tpu.dynamic_rotate %114 by %c15_i32_85 dim 1 : vector<8x512xf32>, i32 -> vector<8x512xf32>
    %130 = arith.mulf %129, %50 : vector<8x512xf32>
    %c160 = arith.constant 160 : index
    %c0_86 = arith.constant 0 : index
    %131 = vector.load %arg6[%c160, %c0_86] : memref<216x512xf32, #tpu.memory_space<vmem>>, vector<8x512xf32>
    tpu.vector_store %arg6[%c160, %c0_86], %130 {strides = array<i32>} : memref<216x512xf32, #tpu.memory_space<vmem>>, vector<8x512xf32>,
    %c1_i32_87 = arith.constant 1 : i32
    %132 = tpu.dynamic_rotate %114 by %c1_i32_87 dim 1 : vector<8x512xf32>, i32 -> vector<8x512xf32>
    %133 = arith.mulf %132, %53 : vector<8x512xf32>
    %c168 = arith.constant 168 : index
    %c0_88 = arith.constant 0 : index
    %134 = vector.load %arg6[%c168, %c0_88] : memref<216x512xf32, #tpu.memory_space<vmem>>, vector<8x512xf32>
    tpu.vector_store %arg6[%c168, %c0_88], %133 {strides = array<i32>} : memref<216x512xf32, #tpu.memory_space<vmem>>, vector<8x512xf32>,
    %c176 = arith.constant 176 : index
    %c0_89 = arith.constant 0 : index
    %135 = vector.load %arg6[%c176, %c0_89] : memref<216x512xf32, #tpu.memory_space<vmem>>, vector<8x512xf32>
    tpu.vector_store %arg6[%c176, %c0_89], %114 {strides = array<i32>} : memref<216x512xf32, #tpu.memory_space<vmem>>, vector<8x512xf32>,
    %c511_i32_90 = arith.constant 511 : i32
    %136 = tpu.dynamic_rotate %114 by %c511_i32_90 dim 1 : vector<8x512xf32>, i32 -> vector<8x512xf32>
    %137 = arith.mulf %136, %56 : vector<8x512xf32>
    %c184 = arith.constant 184 : index
    %c0_91 = arith.constant 0 : index
    %138 = vector.load %arg6[%c184, %c0_91] : memref<216x512xf32, #tpu.memory_space<vmem>>, vector<8x512xf32>
    tpu.vector_store %arg6[%c184, %c0_91], %137 {strides = array<i32>} : memref<216x512xf32, #tpu.memory_space<vmem>>, vector<8x512xf32>,
    %c497_i32_92 = arith.constant 497 : i32
    %139 = tpu.dynamic_rotate %114 by %c497_i32_92 dim 1 : vector<8x512xf32>, i32 -> vector<8x512xf32>
    %140 = arith.mulf %139, %59 : vector<8x512xf32>
    %c192 = arith.constant 192 : index
    %c0_93 = arith.constant 0 : index
    %141 = vector.load %arg6[%c192, %c0_93] : memref<216x512xf32, #tpu.memory_space<vmem>>, vector<8x512xf32>
    tpu.vector_store %arg6[%c192, %c0_93], %140 {strides = array<i32>} : memref<216x512xf32, #tpu.memory_space<vmem>>, vector<8x512xf32>,
    %c496_i32_94 = arith.constant 496 : i32
    %142 = tpu.dynamic_rotate %114 by %c496_i32_94 dim 1 : vector<8x512xf32>, i32 -> vector<8x512xf32>
    %143 = arith.mulf %142, %62 : vector<8x512xf32>
    %c200 = arith.constant 200 : index
    %c0_95 = arith.constant 0 : index
    %144 = vector.load %arg6[%c200, %c0_95] : memref<216x512xf32, #tpu.memory_space<vmem>>, vector<8x512xf32>
    tpu.vector_store %arg6[%c200, %c0_95], %143 {strides = array<i32>} : memref<216x512xf32, #tpu.memory_space<vmem>>, vector<8x512xf32>,
    %c495_i32_96 = arith.constant 495 : i32
    %145 = tpu.dynamic_rotate %114 by %c495_i32_96 dim 1 : vector<8x512xf32>, i32 -> vector<8x512xf32>
    %146 = arith.mulf %145, %65 : vector<8x512xf32>
    %c208 = arith.constant 208 : index
    %c0_97 = arith.constant 0 : index
    %147 = vector.load %arg6[%c208, %c0_97] : memref<216x512xf32, #tpu.memory_space<vmem>>, vector<8x512xf32>
    tpu.vector_store %arg6[%c208, %c0_97], %146 {strides = array<i32>} : memref<216x512xf32, #tpu.memory_space<vmem>>, vector<8x512xf32>,
    %c16_98 = arith.constant 16 : index
    %c0_99 = arith.constant 0 : index
    %148 = vector.load %arg3[%c16_98, %c0_99] : memref<24x216xf32, #tpu.memory_space<vmem>>, vector<8x216xf32>
    %c16_100 = arith.constant 16 : index
    %c0_101 = arith.constant 0 : index
    %149 = vector.load %arg4[%c16_100, %c0_101] : memref<24x1xf32, #tpu.memory_space<vmem>>, vector<8x1xf32>
    %c0_102 = arith.constant 0 : index
    %c0_103 = arith.constant 0 : index
    %150 = vector.load %arg6[%c0_102, %c0_103] : memref<216x512xf32, #tpu.memory_space<vmem>>, vector<216x512xf32>
    %cst_104 = arith.constant dense<0.000000e+00> : vector<8x512xf32>
    %151 = tpu.matmul %148, %150, %cst_104 {dimension_numbers = #tpu.dot_dimension_numbers<[1], [0], [0], [1], [0, 0, 1, 1], [], []>} : vector<8x216xf32>, vector<216x512xf32>, vector<8x512xf32> -> vector<8x512xf32>
    %152 = vector.broadcast %149 : vector<8x1xf32> to vector<8x512xf32>
    %153 = arith.addf %151, %152 : vector<8x512xf32>
    %cst_105 = arith.constant 0.000000e+00 : f32
    %154 = vector.broadcast %cst_105 : f32 to vector<8x512xf32>
    %155 = arith.maximumf %153, %154 : vector<8x512xf32>
    %156 = vector.extract_strided_slice %155 {offsets = [0, 0], sizes = [8, 256], strides = [1, 1]} : vector<8x512xf32> to vector<8x256xf32>
    %c0_106 = arith.constant 0 : index
    %c16_107 = arith.constant 16 : index
    %c0_108 = arith.constant 0 : index
    %157 = vector.load %arg5[%c0_106, %c16_107, %c0_108] : memref<2x24x256xf32, #tpu.memory_space<vmem>>, vector<1x8x256xf32>
    %158 = vector.shape_cast %157 : vector<1x8x256xf32> to vector<8x256xf32>
    %159 = vector.shape_cast %156 : vector<8x256xf32> to vector<1x8x256xf32>
    tpu.vector_store %arg5[%c0_106, %c16_107, %c0_108], %159 {strides = array<i32>} : memref<2x24x256xf32, #tpu.memory_space<vmem>>, vector<1x8x256xf32>,
    %160 = vector.extract_strided_slice %155 {offsets = [0, 256], sizes = [8, 256], strides = [1, 1]} : vector<8x512xf32> to vector<8x256xf32>
    %c1_109 = arith.constant 1 : index
    %c16_110 = arith.constant 16 : index
    %c0_111 = arith.constant 0 : index
    %161 = vector.load %arg5[%c1_109, %c16_110, %c0_111] : memref<2x24x256xf32, #tpu.memory_space<vmem>>, vector<1x8x256xf32>
    %162 = vector.shape_cast %161 : vector<1x8x256xf32> to vector<8x256xf32>
    %163 = vector.shape_cast %160 : vector<8x256xf32> to vector<1x8x256xf32>
    tpu.vector_store %arg5[%c1_109, %c16_110, %c0_111], %163 {strides = array<i32>} : memref<2x24x256xf32, #tpu.memory_space<vmem>>, vector<1x8x256xf32>,
    return
  }
  func.func @transform_0(%arg0: i32) -> (i32, i32) {
    %c0_i32 = arith.constant 0 : i32
    %c0_i32_0 = arith.constant 0 : i32
    return %c0_i32, %arg0 : i32, i32
  }
  func.func @transform_1(%arg0: i32) -> (i32, i32) {
    %c0_i32 = arith.constant 0 : i32
    %c0_i32_0 = arith.constant 0 : i32
    %c0_i32_1 = arith.constant 0 : i32
    return %c0_i32, %c0_i32_0 : i32, i32
  }
  func.func @transform_2(%arg0: i32) -> (i32, i32) {
    %c0_i32 = arith.constant 0 : i32
    %c0_i32_0 = arith.constant 0 : i32
    %c0_i32_1 = arith.constant 0 : i32
    return %c0_i32, %c0_i32_0 : i32, i32
  }
  func.func @transform_3(%arg0: i32) -> (i32, i32) {
    %c0_i32 = arith.constant 0 : i32
    %c0_i32_0 = arith.constant 0 : i32
    %c0_i32_1 = arith.constant 0 : i32
    return %c0_i32, %c0_i32_0 : i32, i32
  }
  func.func @transform_4(%arg0: i32) -> (i32, i32, i32) {
    %c0_i32 = arith.constant 0 : i32
    %c0_i32_0 = arith.constant 0 : i32
    %c0_i32_1 = arith.constant 0 : i32
    return %arg0, %c0_i32, %c0_i32_0 : i32, i32, i32
  }
}

</mosaic_0001>

<bundles_post_ra>
// kernel: tpu_custom_call.1
= control target key start
LH: loop header
LB: loop body
LE: loop exit
PB: predicated region body
PF: predicated region fallthrough
CT: control target
= control target key end

     0   :  { %9 = vsyncpa [#allocation4], 0  ;;  %s2872_s0 = inlined_call_operand.hbm [shape: f32[8,512], index: 0, kind: input, shape index: {}]   ;;  %s2873_s1 = inlined_call_operand.hbm [shape: f32[9,512], index: 1, kind: input, shape index: {}]   ;;  %s2874_s2 = inlined_call_operand.hbm [shape: f32[24,216], index: 2, kind: input, shape index: {}]   ;;  %s2875_s3 = inlined_call_operand.vmem [shape: f32[24,1], index: 3, kind: input, shape index: {}]   ;;  %s2876_s4 = inlined_call_operand.hbm [shape: f32[2,24,256], index: 4, kind: output, shape index: {}]  }
   0x1   :  { %10 = vsyncpa [#allocation7], 0 }
   0x2   :  { %11 = vsyncpa [#allocation5], 0  ;;  %s1969_s15 = smov [#allocation6]   ;;  %s1875_s19 = scalar_lea.hbm %s2873_s1, 1024 }
   0x3   :  { %s27_s16 = sshll.u32 %s1969_s15, 4  ;;  %p1876_p0 = scmp.ne.s32.totalorder %s2873_s1, %s1875_s19  ;;  %s28_s16 = int_to_ptr.vmem [resolvable:$true] %s27_s16 }
   0x4   :  { %p1879_p1 = scmp.lt.u32.totalorder %s1875_s19, %s2873_s1 }
   0x6   :  { %p1881_p2 = pnand %p1879_p1, %p1876_p0 }
   0x8   :  { %1884 = shalt.err (!%p1881_p2)
}
   0x9   :  { %s1885_s24 = scalar_lea.vmem %s28_s16, 1024  ;;  %p1890_p4 = scmp.lt.s32.totalorder %s28_s16, %s28_s16 }
   0xa   :  { %p1886_p3 = scmp.ne.s32.totalorder %s28_s16, %s1885_s24  ;;  %p1891_p5 = scmp.lt.s32.totalorder %s1885_s24, %s1885_s24 }
   0xc   :  { %p1892_p6 = por %p1891_p5, %p1890_p4 }
   0xe   :  { %p1893_p7 = pnand %p1892_p6, %p1886_p3 }
  0x10   :  { %1896 = shalt.err (!%p1893_p7)
}
  0x11   :  { %s1970_s25 = smov 512   ;;  %s1971_s26 = smov 32  }
  0x12   :  { %33 = dma.hbm_to_vmem [thread:$0]  %s2873_s1, 1024, %s28_s16, [#allocation7], %s1970_s25, %s1970_s25, %s1971_s26  }
  0x13   :  { %s1972_s29 = smov [#allocation3]   ;;  %s1973_s5 = smov [#allocation8]  }
  0x14   :  { %s18_s30 = sshll.u32 %s1972_s29, 4  ;;  %s39_s6 = sshll.u32 %s1973_s5, 4  ;;  %s19_s30 = int_to_ptr.vmem [resolvable:$true] %s18_s30  ;;  %s40_s6 = int_to_ptr.vmem [resolvable:$true] %s39_s6 }
  0x15   :  { %s1897_s9 = scalar_lea.hbm %s2872_s0, 512 }
  0x16   :  { %p1898_p8 = scmp.ne.s32.totalorder %s2872_s0, %s1897_s9  ;;  %p1901_p9 = scmp.lt.u32.totalorder %s1897_s9, %s2872_s0 }
  0x18   :  { %p1903_p10 = pnand %p1901_p9, %p1898_p8 }
  0x1a   :  { %1906 = shalt.err (!%p1903_p10)
}
  0x1b   :  { %s1907_s1 = scalar_lea.vmem %s19_s30, 512  ;;  %p1912_p12 = scmp.lt.s32.totalorder %s19_s30, %s19_s30 }
  0x1c   :  { %p1908_p11 = scmp.ne.s32.totalorder %s19_s30, %s1907_s1  ;;  %p1913_p13 = scmp.lt.s32.totalorder %s1907_s1, %s1907_s1 }
  0x1e   :  { %p1914_p0 = por %p1913_p13, %p1912_p12 }
  0x20   :  { %p1915_p1 = pnand %p1914_p0, %p1908_p11 }
  0x22   :  { %1918 = shalt.err (!%p1915_p1)
}
  0x23   :  { %21 = dma.hbm_to_vmem [thread:$0]  %s2872_s0, 512, %s19_s30, [#allocation4]  }
  0x24   :  { %s1919_s18 = scalar_lea.hbm %s2874_s2, 768 }
  0x25   :  { %p1920_p2 = scmp.ne.s32.totalorder %s2874_s2, %s1919_s18  ;;  %p1923_p3 = scmp.lt.u32.totalorder %s1919_s18, %s2874_s2 }
  0x27   :  { %p1925_p4 = pnand %p1923_p3, %p1920_p2 }
  0x29   :  { %1928 = shalt.err (!%p1925_p4)
}
  0x2a   :  { %s1929_s23 = scalar_lea.vmem %s40_s6, 768  ;;  %p1934_p6 = scmp.lt.s32.totalorder %s40_s6, %s40_s6 }
  0x2b   :  { %p1930_p5 = scmp.ne.s32.totalorder %s40_s6, %s1929_s23  ;;  %p1935_p7 = scmp.lt.s32.totalorder %s1929_s23, %s1929_s23 }
  0x2d   :  { %p1936_p8 = por %p1935_p7, %p1934_p6 }
  0x2f   :  { %p1937_p9 = pnand %p1936_p8, %p1930_p5 }
  0x31   :  { %1940 = shalt.err (!%p1937_p9)
}
  0x32   :  { %s1974_s0 = smov 256   ;;  %s1975_s24 = smov 16  }
  0x33   :  { %45 = dma.hbm_to_vmem [thread:$0]  %s2874_s2, 768, %s40_s6, [#allocation7], %s1974_s0, %s1974_s0, %s1975_s24  }
  0x34   :  { %1963 = dma.done.wait [#allocation4], 512  }
  0x35   :  { %1964 = vsyncadd [#allocation4], 4294966784 }
  0x36   :  { %1965 = dma.done.wait [#allocation7], 1792  }
  0x37   :  { %1966 = vsyncadd [#allocation7], 4294965504  ;;  %v2050_v0 = vld [vmem:[#allocation3 + $0x10] sm:$0xff]  ;;  %v2052_v1 = vld [vmem:[#allocation3] sm:$0xff]  ;;  %s1976_s27 = smov 17   ;;  %s1977_s2 = smov 15   ;;  %v69_v7 = vlaneseq }
  0x38   :  { %65 = vrot.lane.b32.xlu1 %v2050_v0, %s1976_s27  ;;  %61 = vrot.lane.b32.xlu0 %v2052_v1, %s1976_s27  ;;  %v2058_v2 = vld [vmem:[#allocation3 + $0x18] sm:$0xff]  ;;  %v2060_v3 = vld [vmem:[#allocation3 + $0x8] sm:$0xff]  ;;  %s1978_s28 = smov 1   ;;  %s1979_s29 = smov 127   ;;  %v1982_v4 = vmov 0.0   ;;  %v595_v5 = vld [vmem:[%s2875_s3] sm:$0xff] }
  0x39   :  { %s1980_s30 = smov 113   ;;  %s1981_s5 = smov 112   ;;  %705 = vmatprep.mubr.f32.mxu0 %v1982_v4  ;;  %776 = vmatprep.mubr.f32.mxu1 %v1982_v4  ;;  %v1984_v6 = vmov 0   ;;  %v79_v8 = vshrl.u32 %v69_v7, 7  ;;  %v2125_v11 = vand.u32 127, %v69_v7  ;;  %vm637_vm8 = vcmask 588800  }
  0x3a   :  { %s1983_s6 = smov 111   ;;  %1873 = vset.pattern.permute.xlu0 %v1984_v6  ;;  %1874 = vset.pattern.permute.xlu1 %v1984_v6  ;;  %v76_v13 = vld [vmem:[#allocation6] ss:$8 sm:$0xf]  ;;  %vm1036_vm9 = vcmask 130048   ;;  %vm1470_vm10 = vcmask 719872  }
  0x3b   :  { %v2127_v12 = vsub.s32 1, %v79_v8  ;;  %v120_v14 = vld [vmem:[#allocation6 + $0x1] ss:$8 sm:$0xf]  ;;  %vm71_vm0 = vcmp.lt.s32.totalorder %v2125_v11, 17  ;;  %v2130_v15 = vsub.s32 0, %v79_v8 }
  0x3c   :  { %67 = vrot.lane.b32.xlu1 %v2058_v2, %s1976_s27  ;;  %63 = vrot.lane.b32.xlu0 %v2060_v3, %s1976_s27  ;;  %v2132_v16 = vsub.s32 2, %v79_v8  ;;  %v2134_v17 = vsub.s32 3, %v79_v8  ;;  %vm114_vm1 = vcmp.lt.s32.totalorder %v2125_v11, 16  ;;  %v164_v54 = vld [vmem:[#allocation6 + $0x2] ss:$8 sm:$0xf] }
  0x3d   :  { %v85_v20 = vrot.slane %v76_v13, %v2127_v12  ;;  %v129_v21 = vrot.slane %v120_v14, %v2127_v12  ;;  %v81_v23 = vrot.slane %v76_v13, %v2130_v15  ;;  %v125_v30 = vrot.slane %v120_v14, %v2130_v15  ;;  %v208_v55 = vld [vmem:[#allocation6 + $0x3] ss:$8 sm:$0xf] }
  0x3e   :  { %v93_v24 = vrot.slane %v76_v13, %v2134_v17  ;;  %v89_v25 = vrot.slane %v76_v13, %v2132_v16  ;;  %v133_v31 = vrot.slane %v120_v14, %v2132_v16  ;;  %v137_v35 = vrot.slane %v120_v14, %v2134_v17 }
  0x3f   :  { %vm158_vm2 = vcmp.lt.s32.totalorder %v2125_v11, 15  ;;  %v173_v58 = vrot.slane %v164_v54, %v2127_v12  ;;  %vm202_vm3 = vcmp.lt.s32.totalorder %v2125_v11, 1  ;;  %v217_v59 = vrot.slane %v208_v55, %v2127_v12 }
  0x40   :  { %108 = vrot.lane.b32.xlu1 %v2060_v3, %s1975_s24  ;;  %106 = vrot.lane.b32.xlu0 %v2052_v1, %s1975_s24  ;;  %v169_v61 = vrot.slane %v164_v54, %v2130_v15  ;;  %v177_v62 = vrot.slane %v164_v54, %v2132_v16  ;;  %v181_v63 = vrot.slane %v164_v54, %v2134_v17  ;;  %vm250_vm4 = vcmp.lt.s32.totalorder %v2125_v11, 127 }
  0x41   :  { %v213_v8 = vrot.slane %v208_v55, %v2130_v15  ;;  %vm338_vm5 = vcmp.lt.s32.totalorder %v2125_v11, 112  ;;  %vm294_vm6 = vcmp.lt.s32.totalorder %v2125_v11, 113  ;;  %vm382_vm7 = vcmp.lt.s32.totalorder %v2125_v11, 111 }
  0x44   :  { %112 = vrot.lane.b32.xlu1 %v2058_v2, %s1975_s24  ;;  %110 = vrot.lane.b32.xlu0 %v2050_v0, %s1975_s24 }
  0x48   :  { %152 = vrot.lane.b32.xlu1 %v2060_v3, %s1977_s2  ;;  %150 = vrot.lane.b32.xlu0 %v2052_v1, %s1977_s2 }
  0x4c   :  { %156 = vrot.lane.b32.xlu1 %v2058_v2, %s1977_s2  ;;  %154 = vrot.lane.b32.xlu0 %v2050_v0, %s1977_s2 }
  0x50   :  { %196 = vrot.lane.b32.xlu1 %v2060_v3, %s1978_s28  ;;  %194 = vrot.lane.b32.xlu0 %v2052_v1, %s1978_s28 }
  0x54   :  { %200 = vrot.lane.b32.xlu1 %v2058_v2, %s1978_s28  ;;  %198 = vrot.lane.b32.xlu0 %v2050_v0, %s1978_s28 }
  0x58   :  { %244 = vrot.lane.b32.xlu1 %v2060_v3, %s1979_s29  ;;  %242 = vrot.lane.b32.xlu0 %v2052_v1, %s1979_s29 }
  0x5c   :  { %248 = vrot.lane.b32.xlu1 %v2058_v2, %s1979_s29  ;;  %246 = vrot.lane.b32.xlu0 %v2050_v0, %s1979_s29 }
  0x60   :  { %288 = vrot.lane.b32.xlu1 %v2060_v3, %s1980_s30  ;;  %286 = vrot.lane.b32.xlu0 %v2052_v1, %s1980_s30 }
  0x64   :  { %292 = vrot.lane.b32.xlu1 %v2058_v2, %s1980_s30  ;;  %290 = vrot.lane.b32.xlu0 %v2050_v0, %s1980_s30 }
  0x68   :  { %332 = vrot.lane.b32.xlu1 %v2060_v3, %s1981_s5  ;;  %330 = vrot.lane.b32.xlu0 %v2052_v1, %s1981_s5 }
  0x6c   :  { %336 = vrot.lane.b32.xlu1 %v2058_v2, %s1981_s5  ;;  %334 = vrot.lane.b32.xlu0 %v2050_v0, %s1981_s5 }
  0x70   :  { %376 = vrot.lane.b32.xlu1 %v2060_v3, %s1983_s6  ;;  %374 = vrot.lane.b32.xlu0 %v2052_v1, %s1983_s6 }
  0x74   :  { %380 = vrot.lane.b32.xlu1 %v2058_v2, %s1983_s6  ;;  %378 = vrot.lane.b32.xlu0 %v2050_v0, %s1983_s6 }
  0x78   :  { %634 = vperm.xlu0 %1873, %v595_v5  }
  0xaa   :  { %v66_v9 = vpop.permute.xlu1 %65  ;;  %v62_v10 = vpop.permute.xlu0 %61 }
  0xae   :  { %v68_v18 = vpop.permute.xlu1 %67  ;;  %v64_v19 = vpop.permute.xlu0 %63 }
  0xaf   :  { %v74_v22 = vsel %vm71_vm0, %v62_v10, %v64_v19  ;;  %v75_v28 = vsel %vm71_vm0, %v68_v18, %v62_v10  ;;  %v72_v32 = vsel %vm71_vm0, %v66_v9, %v68_v18  ;;  %v73_v36 = vsel %vm71_vm0, %v64_v19, %v66_v9 }
  0xb0   :  { %v99_v33 = vmul.f32 %v85_v20, %v74_v22  ;;  %v98_v37 = vmul.f32 %v81_v23, %v75_v28  ;;  %v101_v41 = vmul.f32 %v93_v24, %v72_v32  ;;  %v100_v45 = vmul.f32 %v89_v25, %v73_v36  ;;  %v256_v32 = vld [vmem:[#allocation6 + $0x5] ss:$8 sm:$0xf] }
  0xb1   :  { %v221_v9 = vrot.slane %v208_v55, %v2132_v16  ;;  %v225_v18 = vrot.slane %v208_v55, %v2134_v17 }
  0xb2   :  { %v109_v26 = vpop.permute.xlu1 %108  ;;  %v107_v27 = vpop.permute.xlu0 %106 }
  0xb3   :  { %v117_v29 = vsel %vm114_vm1, %v107_v27, %v109_v26 }
  0xb4   :  { %v143_v34 = vmul.f32 %v129_v21, %v117_v29 }
  0xb6   :  { %v113_v38 = vpop.permute.xlu1 %112  ;;  %v111_v39 = vpop.permute.xlu0 %110  ;;  %v2155_v40 = vpack.c.bf16 %v143_v34, %v99_v33 }
  0xb7   :  { %v118_v42 = vsel %vm114_vm1, %v113_v38, %v107_v27  ;;  %v115_v43 = vsel %vm114_vm1, %v111_v39, %v113_v38  ;;  %v116_v44 = vsel %vm114_vm1, %v109_v26, %v111_v39  ;;  %v261_v38 = vrot.slane %v256_v32, %v2130_v15 }
  0xb8   :  { %v142_v46 = vmul.f32 %v125_v30, %v118_v42  ;;  %v144_v47 = vmul.f32 %v133_v31, %v116_v44  ;;  %v145_v48 = vmul.f32 %v137_v35, %v115_v43  ;;  %1649 = vmatprep.subr.bf16.mxu0 %v2155_v40  ;;  %v273_v39 = vrot.slane %v256_v32, %v2134_v17 }
  0xb9   :  { %v265_v42 = vrot.slane %v256_v32, %v2127_v12  ;;  %v269_v43 = vrot.slane %v256_v32, %v2132_v16 }
  0xba   :  { %v153_v49 = vpop.permute.xlu1 %152  ;;  %v151_v50 = vpop.permute.xlu0 %150  ;;  %v2164_v51 = vpack.c.bf16 %v142_v46, %v98_v37  ;;  %v2166_v52 = vpack.c.bf16 %v145_v48, %v101_v41  ;;  %v2168_v53 = vpack.c.bf16 %v144_v47, %v100_v45 }
  0xbb   :  { %v161_v60 = vsel %vm158_vm2, %v151_v50, %v153_v49 }
  0xbc   :  { %1651 = vmatpush1.bf16.msra.mxu0 %v2164_v51  ;;  %1665 = vmatprep.subr.bf16.mxu1 %v2166_v52  ;;  %v187_v10 = vmul.f32 %v173_v58, %v161_v60 }
  0xbd   :  { %1667 = vmatpush1.bf16.msra.mxu1 %v2168_v53 }
  0xbe   :  { %v157_v56 = vpop.permute.xlu1 %156  ;;  %v155_v57 = vpop.permute.xlu0 %154 }
  0xbf   :  { %v162_v6 = vsel %vm158_vm2, %v157_v56, %v151_v50  ;;  %v160_v13 = vsel %vm158_vm2, %v153_v49, %v155_v57  ;;  %v159_v19 = vsel %vm158_vm2, %v155_v57, %v157_v56 }
  0xc0   :  { %v186_v20 = vmul.f32 %v169_v61, %v162_v6  ;;  %v188_v24 = vmul.f32 %v177_v62, %v160_v13  ;;  %v189_v28 = vmul.f32 %v181_v63, %v159_v19  ;;  %v344_v63 = vld [vmem:[#allocation6 + $0x7] ss:$8 sm:$0xf] }
  0xc1   :  { %v361_v13 = vrot.slane %v344_v63, %v2134_v17 }
  0xc2   :  { %v197_v4 = vpop.permute.xlu1 %196  ;;  %v195_v5 = vpop.permute.xlu0 %194 }
  0xc3   :  { %v205_v7 = vsel %vm202_vm3, %v195_v5, %v197_v4 }
  0xc4   :  { %v231_v14 = vmul.f32 %v217_v59, %v205_v7 }
  0xc6   :  { %v201_v21 = vpop.permute.xlu1 %200  ;;  %v199_v22 = vpop.permute.xlu0 %198  ;;  %v2193_v23 = vpack.c.bf16 %v231_v14, %v187_v10  ;;  %v353_v14 = vrot.slane %v344_v63, %v2127_v12 }
  0xc7   :  { %v206_v25 = vsel %vm202_vm3, %v201_v21, %v195_v5  ;;  %v203_v26 = vsel %vm202_vm3, %v199_v22, %v201_v21  ;;  %v204_v27 = vsel %vm202_vm3, %v197_v4, %v199_v22  ;;  %v300_v4 = vld [vmem:[#allocation6 + $0x6] ss:$8 sm:$0xf] }
  0xc8   :  { %v230_v29 = vmul.f32 %v213_v8, %v206_v25  ;;  %v232_v30 = vmul.f32 %v221_v9, %v204_v27  ;;  %v233_v31 = vmul.f32 %v225_v18, %v203_v26  ;;  %1653 = vmatprep.subr.bf16.mxu0 %v2193_v23  ;;  %v313_v7 = vrot.slane %v300_v4, %v2132_v16 }
  0xc9   :  { %v349_v9 = vrot.slane %v344_v63, %v2130_v15  ;;  %v357_v18 = vrot.slane %v344_v63, %v2132_v16  ;;  %v305_v19 = vrot.slane %v300_v4, %v2130_v15 }
  0xca   :  { %v245_v33 = vpop.permute.xlu1 %244  ;;  %v243_v34 = vpop.permute.xlu0 %242  ;;  %v2203_v35 = vpack.c.bf16 %v230_v29, %v186_v20  ;;  %v2205_v36 = vpack.c.bf16 %v233_v31, %v189_v28  ;;  %v2207_v37 = vpack.c.bf16 %v232_v30, %v188_v24 }
  0xcb   :  { %v253_v41 = vsel %vm250_vm4, %v243_v34, %v245_v33 }
  0xcc   :  { %1655 = vmatpush1.bf16.msra.mxu0 %v2203_v35  ;;  %1669 = vmatprep.subr.bf16.mxu1 %v2205_v36  ;;  %v278_v46 = vmul.f32 %v261_v38, %v253_v41  ;;  %v388_v41 = vld [vmem:[#allocation6 + $0x20] ss:$8 sm:$0xf] }
  0xcd   :  { %1671 = vmatpush1.bf16.msra.mxu1 %v2207_v37 }
  0xce   :  { %v249_v44 = vpop.permute.xlu1 %248  ;;  %v247_v45 = vpop.permute.xlu0 %246  ;;  %v2234_v61 = vpack.c.bf16 %v278_v46, %v2052_v1  ;;  %v309_v1 = vrot.slane %v300_v4, %v2127_v12 }
  0xcf   :  { %v254_v47 = vsel %vm250_vm4, %v249_v44, %v243_v34  ;;  %v251_v48 = vsel %vm250_vm4, %v247_v45, %v249_v44  ;;  %v252_v49 = vsel %vm250_vm4, %v245_v33, %v247_v45 }
  0xd0   :  { %v281_v50 = vmul.f32 %v273_v39, %v254_v47  ;;  %v279_v54 = vmul.f32 %v265_v42, %v252_v49  ;;  %v280_v55 = vmul.f32 %v269_v43, %v251_v48  ;;  %v405_v47 = vrot.slane %v388_v41, %v2134_v17 }
  0xd1   :  { %v397_v48 = vrot.slane %v388_v41, %v2127_v12  ;;  %v401_v49 = vrot.slane %v388_v41, %v2132_v16 }
  0xd2   :  { %v289_v56 = vpop.permute.xlu1 %288  ;;  %v287_v57 = vpop.permute.xlu0 %286  ;;  %v2225_v58 = vpack.c.bf16 %v279_v54, %v2060_v3  ;;  %v2228_v59 = vpack.c.bf16 %v281_v50, %v2058_v2  ;;  %v2231_v60 = vpack.c.bf16 %v280_v55, %v2050_v0  ;;  %v317_v0 = vrot.slane %v300_v4, %v2134_v17 }
  0xd3   :  { %v297_v21 = vsel %vm294_vm6, %v287_v57, %v289_v56  ;;  %v393_v50 = vrot.slane %v388_v41, %v2130_v15 }
  0xd4   :  { %1657 = vmatprep.subr.bf16.mxu0 %v2225_v58  ;;  %1673 = vmatprep.subr.bf16.mxu1 %v2228_v59  ;;  %v322_v38 = vmul.f32 %v305_v19, %v297_v21 }
  0xd5   :  { %1659 = vmatpush1.bf16.msra.mxu0 %v2234_v61  ;;  %1675 = vmatpush1.bf16.msra.mxu1 %v2231_v60 }
  0xd6   :  { %v293_v62 = vpop.permute.xlu1 %292  ;;  %v291_v3 = vpop.permute.xlu0 %290 }
  0xd7   :  { %v298_v6 = vsel %vm294_vm6, %v293_v62, %v287_v57  ;;  %v296_v8 = vsel %vm294_vm6, %v289_v56, %v291_v3  ;;  %v295_v20 = vsel %vm294_vm6, %v291_v3, %v293_v62 }
  0xd8   :  { %v325_v22 = vmul.f32 %v317_v0, %v298_v6  ;;  %v323_v24 = vmul.f32 %v309_v1, %v296_v8  ;;  %v324_v31 = vmul.f32 %v313_v7, %v295_v20 }
  0xda   :  { %v333_v2 = vpop.permute.xlu1 %332  ;;  %v331_v5 = vpop.permute.xlu0 %330 }
  0xdb   :  { %v341_v10 = vsel %vm338_vm5, %v331_v5, %v333_v2 }
  0xdc   :  { %v366_v27 = vmul.f32 %v349_v9, %v341_v10 }
  0xde   :  { %v337_v25 = vpop.permute.xlu1 %336  ;;  %v335_v26 = vpop.permute.xlu0 %334  ;;  %v2273_v46 = vpack.c.bf16 %v366_v27, %v322_v38 }
  0xdf   :  { %v342_v28 = vsel %vm338_vm5, %v337_v25, %v331_v5  ;;  %v339_v29 = vsel %vm338_vm5, %v335_v26, %v337_v25  ;;  %v340_v30 = vsel %vm338_vm5, %v333_v2, %v335_v26  ;;  %v594_v2 = vld [vmem:[#allocation8] sm:$0xff]  ;;  %v958_v25 = vld [vmem:[%s2875_s3 + $0x8] sm:$0xff] }
  0xe0   :  { %v369_v32 = vmul.f32 %v361_v13, %v342_v28  ;;  %v367_v33 = vmul.f32 %v353_v14, %v340_v30  ;;  %v368_v34 = vmul.f32 %v357_v18, %v339_v29  ;;  %v418_v26 = vld [vmem:[#allocation6] ss:$8 sm:$0xf] }
  0xe1   :  { %v2399_v29 = vrot.slane %v418_v26, %v2127_v12  ;;  %v2413_v41 = vrot.slane %v418_v26, %v2134_v17 }
  0xe2   :  { %v377_v39 = vpop.permute.xlu1 %376  ;;  %v375_v42 = vpop.permute.xlu0 %374  ;;  %v2266_v43 = vpack.c.bf16 %v367_v33, %v323_v24  ;;  %v2268_v44 = vpack.c.bf16 %v369_v32, %v325_v22  ;;  %v2270_v45 = vpack.c.bf16 %v368_v34, %v324_v31  ;;  %v957_v24 = vld [vmem:[#allocation8 + $0x18] sm:$0xff]  ;;  %v2402_v32 = vrot.slane %v418_v26, %v2132_v16 }
  0xe3   :  { %v385_v54 = vsel %vm382_vm7, %v375_v42, %v377_v39  ;;  %2900 = vst [vmem:[#allocation15_spill] sm:$0xff] %v2413_v41 }
  0xe4   :  { %1661 = vmatprep.subr.bf16.mxu0 %v2266_v43  ;;  %1677 = vmatprep.subr.bf16.mxu1 %v2268_v44  ;;  %v2297_v1 = vmul.f32 %v393_v50, %v385_v54  ;;  %2898 = vst [vmem:[#allocation13_spill] sm:$0xff] %v2402_v32 }
  0xe5   :  { %1663 = vmatpush1.bf16.msra.mxu0 %v2273_v46  ;;  %1679 = vmatpush1.bf16.msra.mxu1 %v2270_v45 }
  0xe6   :  { %v381_v55 = vpop.permute.xlu1 %380  ;;  %v379_v56 = vpop.permute.xlu0 %378 }
  0xe7   :  { %v386_v57 = vsel %vm382_vm7, %v381_v55, %v375_v42  ;;  %v383_v62 = vsel %vm382_vm7, %v379_v56, %v381_v55  ;;  %v384_v3 = vsel %vm382_vm7, %v377_v39, %v379_v56  ;;  %v2410_v39 = vrot.slane %v418_v26, %v2130_v15 }
  0xe8   :  { %v2291_v63 = vmul.f32 %v405_v47, %v386_v57  ;;  %v2293_v4 = vmul.f32 %v397_v48, %v384_v3  ;;  %v2295_v0 = vmul.f32 %v401_v49, %v383_v62 }
  0xe9   :  { %2899 = vst [vmem:[#allocation14_spill] sm:$0xff] %v2410_v39 }
  0xea   :  { %657 = vmatprep.subr.mxu0 %v2293_v4  ;;  %728 = vmatprep.subr.mxu1 %v2291_v63 }
  0xeb   :  { %658 = vmatpush1.msra.mxu0 %v2297_v1  ;;  %729 = vmatpush1.msra.mxu1 %v2295_v0 }
  0xec   :  { %1642 = vmatmul.mubr.msk.f32.vlgmr.msra.gmra.mrb[0].mxu0 %vm637_vm8, %v594_v2  ;;  %1643 = vmatmul.mubr.msk.f32.vlgmr.msra.gmra.mrb[0].mxu1 %vm637_vm8, %v594_v2 }
  0xed   :  { %1681 = vmatprep.subr.bf16.mxu0 %v2155_v40  ;;  %1717 = vmatprep.subr.bf16.mxu1 %v2166_v52 }
  0xee   :  { %1683 = vmatpush1.bf16.msra.mxu0 %v2164_v51  ;;  %1719 = vmatpush1.bf16.msra.mxu1 %v2168_v53 }
  0xef   :  { %1685 = vmatprep.subr.bf16.mxu0 %v2193_v23  ;;  %1721 = vmatprep.subr.bf16.mxu1 %v2205_v36 }
  0xf0   :  { %1644 = vmatprep.mubr.msk.f32.mxu0 %vm1036_vm9, %v957_v24  ;;  %1645 = vmatprep.mubr.msk.f32.mxu1 %vm1036_vm9, %v957_v24 }
  0xf2   :  { %1687 = vmatpush1.bf16.msra.mxu0 %v2203_v35  ;;  %1723 = vmatpush1.bf16.msra.mxu1 %v2207_v37 }
  0xf3   :  { %1689 = vmatprep.subr.bf16.mxu0 %v2225_v58  ;;  %1725 = vmatprep.subr.bf16.mxu1 %v2228_v59 }
  0xf6   :  { %1691 = vmatpush1.bf16.msra.mxu0 %v2234_v61  ;;  %1727 = vmatpush1.bf16.msra.mxu1 %v2231_v60 }
  0xf7   :  { %1693 = vmatprep.subr.bf16.mxu0 %v2266_v43  ;;  %1729 = vmatprep.subr.bf16.mxu1 %v2268_v44  ;;  %v635_v5 = vpop.permute.xlu0 %634 }
  0xfa   :  { %1695 = vmatpush1.bf16.msra.mxu0 %v2273_v46  ;;  %1731 = vmatpush1.bf16.msra.mxu1 %v2270_v45 }
 0x1bf   :  { %v707_v6 = vpop.f32.mrb[0].mxu0  ;;  %v778_v7 = vpop.f32.mrb[0].mxu1 }
 0x1c0   :  { %v708_v8 = vadd.f32 %v707_v6, %v635_v5  ;;  %v779_v9 = vadd.f32 %v778_v7, %v635_v5  ;;  %v709_v10 = vpop.f32.mrb[1].mxu0  ;;  %v780_v13 = vpop.f32.mrb[1].mxu1  ;;  %v462_v6 = vld [vmem:[#allocation6 + $0x2] ss:$8 sm:$0xf] }
 0x1c1   :  { %v710_v14 = vadd.f32 %v709_v10, %v635_v5  ;;  %v781_v18 = vadd.f32 %v780_v13, %v635_v5  ;;  %v440_v5 = vld [vmem:[#allocation6 + $0x1] ss:$8 sm:$0xf] }
 0x1c2   :  { %v2319_v19 = vmax.f32 %v708_v8, 0.0  ;;  %v2321_v20 = vmax.f32 %v779_v9, 0.0  ;;  %v2442_v9 = vrot.slane %v462_v6, %v2127_v12 }
 0x1c3   :  { %v2323_v21 = vmax.f32 %v710_v14, 0.0  ;;  %v2325_v22 = vmax.f32 %v781_v18, 0.0  ;;  %v2450_v14 = vrot.slane %v440_v5, %v2134_v17  ;;  %v2453_v18 = vrot.slane %v462_v6, %v2132_v16 }
 0x1c4   :  { %787 = vst [vmem:[#allocation9] sm:$0xff] %v2319_v19  ;;  %790 = vst [vmem:[#allocation9 + $0x30] sm:$0xff] %v2321_v20  ;;  %796 = vrot.lane.b32.xlu0 %v2321_v20, %s1976_s27  ;;  %792 = vrot.lane.b32.xlu1 %v2319_v19, %s1976_s27 }
 0x1c5   :  { %788 = vst [vmem:[#allocation9 + $0x8] sm:$0xff] %v2323_v21  ;;  %791 = vst [vmem:[#allocation9 + $0x38] sm:$0xff] %v2325_v22 }
 0x1c6   :  { %2901 = vst [vmem:[#allocation16_spill] sm:$0xff] %v2442_v9  ;;  %2903 = vst [vmem:[#allocation18_spill] sm:$0xff] %v2450_v14 }
 0x1c7   :  { %2904 = vst [vmem:[#allocation19_spill] sm:$0xff] %v2453_v18 }
 0x1c8   :  { %812 = vrot.lane.b32.xlu0 %v2319_v19, %s1975_s24  ;;  %794 = vrot.lane.b32.xlu1 %v2323_v21, %s1976_s27 }
 0x1cc   :  { %816 = vrot.lane.b32.xlu0 %v2321_v20, %s1975_s24  ;;  %798 = vrot.lane.b32.xlu1 %v2325_v22, %s1976_s27 }
 0x1d0   :  { %832 = vrot.lane.b32.xlu0 %v2319_v19, %s1977_s2  ;;  %814 = vrot.lane.b32.xlu1 %v2323_v21, %s1975_s24 }
 0x1d4   :  { %836 = vrot.lane.b32.xlu0 %v2321_v20, %s1977_s2  ;;  %818 = vrot.lane.b32.xlu1 %v2325_v22, %s1975_s24 }
 0x1d8   :  { %852 = vrot.lane.b32.xlu0 %v2319_v19, %s1978_s28  ;;  %834 = vrot.lane.b32.xlu1 %v2323_v21, %s1977_s2 }
 0x1dc   :  { %856 = vrot.lane.b32.xlu0 %v2321_v20, %s1978_s28  ;;  %838 = vrot.lane.b32.xlu1 %v2325_v22, %s1977_s2 }
 0x1e0   :  { %876 = vrot.lane.b32.xlu0 %v2319_v19, %s1979_s29  ;;  %854 = vrot.lane.b32.xlu1 %v2323_v21, %s1978_s28 }
 0x1e4   :  { %880 = vrot.lane.b32.xlu0 %v2321_v20, %s1979_s29  ;;  %858 = vrot.lane.b32.xlu1 %v2325_v22, %s1978_s28 }
 0x1e8   :  { %896 = vrot.lane.b32.xlu0 %v2319_v19, %s1980_s30  ;;  %878 = vrot.lane.b32.xlu1 %v2323_v21, %s1979_s29 }
 0x1ec   :  { %900 = vrot.lane.b32.xlu0 %v2321_v20, %s1980_s30  ;;  %882 = vrot.lane.b32.xlu1 %v2325_v22, %s1979_s29 }
 0x1f0   :  { %916 = vrot.lane.b32.xlu0 %v2319_v19, %s1981_s5  ;;  %898 = vrot.lane.b32.xlu1 %v2323_v21, %s1980_s30 }
 0x1f4   :  { %920 = vrot.lane.b32.xlu0 %v2321_v20, %s1981_s5  ;;  %902 = vrot.lane.b32.xlu1 %v2325_v22, %s1980_s30 }
 0x1f8   :  { %936 = vrot.lane.b32.xlu0 %v2319_v19, %s1983_s6  ;;  %918 = vrot.lane.b32.xlu1 %v2323_v21, %s1981_s5 }
 0x1fc   :  { %940 = vrot.lane.b32.xlu0 %v2321_v20, %s1983_s6  ;;  %922 = vrot.lane.b32.xlu1 %v2325_v22, %s1981_s5 }
 0x200   :  { %1033 = vperm.xlu0 %1873, %v958_v25   ;;  %938 = vrot.lane.b32.xlu1 %v2323_v21, %s1983_s6  ;;  %v2458_v25 = vrot.slane %v462_v6, %v2130_v15 }
 0x202   :  { %2905 = vst [vmem:[#allocation20_spill] sm:$0xff] %v2458_v25 }
 0x204   :  { %942 = vrot.lane.b32.xlu1 %v2325_v22, %s1983_s6 }
 0x236   :  { %v797_v27 = vpop.permute.xlu0 %796  ;;  %v793_v28 = vpop.permute.xlu1 %792 }
 0x23a   :  { %v813_v30 = vpop.permute.xlu0 %812  ;;  %v795_v31 = vpop.permute.xlu1 %794 }
 0x23b   :  { %v802_v33 = vsel %vm71_vm0, %v793_v28, %v795_v31  ;;  %v801_v34 = vsel %vm71_vm0, %v795_v31, %v797_v27  ;;  %v2465_v31 = vrot.slane %v462_v6, %v2134_v17 }
 0x23c   :  { %v805_v38 = vmul.f32 %v802_v33, %v2399_v29  ;;  %v806_v49 = vmul.f32 %v801_v34, %v2402_v32  ;;  %v484_v33 = vld [vmem:[#allocation6 + $0x3] ss:$8 sm:$0xf]  ;;  %v2468_v34 = vrot.slane %v440_v5, %v2132_v16 }
 0x23d   :  { %2906 = vst [vmem:[#allocation21_spill] sm:$0xff] %v2465_v31 }
 0x23e   :  { %v817_v42 = vpop.permute.xlu0 %816  ;;  %v799_v47 = vpop.permute.xlu1 %798  ;;  %v2416_v48 = vpack.c.bf16 %v805_v38, %v2293_v4  ;;  %v2433_v2 = vpack.c.bf16 %v806_v49, %v2295_v0  ;;  %v2447_v0 = vrot.slane %v440_v5, %v2130_v15 }
 0x23f   :  { %v800_v50 = vsel %vm71_vm0, %v797_v27, %v799_v47  ;;  %v803_v54 = vsel %vm71_vm0, %v799_v47, %v793_v28 }
 0x240   :  { %v804_v55 = vmul.f32 %v803_v54, %v2410_v39  ;;  %v807_v56 = vmul.f32 %v800_v50, %v2413_v41  ;;  %1697 = vmatprep.subr.bf16.mxu0 %v2416_v48  ;;  %2902 = vst [vmem:[#allocation17_spill] sm:$0xff] %v2447_v0 }
 0x242   :  { %v2427_v57 = vpack.c.bf16 %v804_v55, %v2297_v1  ;;  %v833_v62 = vpop.permute.xlu0 %832  ;;  %v815_v3 = vpop.permute.xlu1 %814  ;;  %v2430_v4 = vpack.c.bf16 %v807_v56, %v2291_v63  ;;  %v2439_v1 = vrot.slane %v440_v5, %v2127_v12 }
 0x243   :  { %v822_v63 = vsel %vm114_vm1, %v813_v30, %v815_v3  ;;  %v821_v49 = vsel %vm114_vm1, %v815_v3, %v817_v42 }
 0x244   :  { %1699 = vmatpush1.bf16.msra.mxu0 %v2427_v57  ;;  %1733 = vmatprep.subr.bf16.mxu1 %v2430_v4  ;;  %v825_v26 = vmul.f32 %v822_v63, %v2439_v1  ;;  %v2484_v63 = vrot.slane %v484_v33, %v2127_v12 }
 0x245   :  { %1735 = vmatpush1.bf16.msra.mxu1 %v2433_v2 }
 0x246   :  { %v837_v7 = vpop.permute.xlu0 %836  ;;  %v819_v8 = vpop.permute.xlu1 %818  ;;  %2907 = vst [vmem:[#allocation22_spill] sm:$0xff] %v2484_v63 }
 0x247   :  { %v820_v38 = vsel %vm114_vm1, %v817_v42, %v819_v8  ;;  %v823_v47 = vsel %vm114_vm1, %v819_v8, %v813_v30 }
 0x248   :  { %v824_v30 = vmul.f32 %v823_v47, %v2447_v0  ;;  %v827_v8 = vmul.f32 %v820_v38, %v2450_v14  ;;  %v2504_v47 = vrot.slane %v484_v33, %v2130_v15 }
 0x24a   :  { %v853_v10 = vpop.permute.xlu0 %852  ;;  %v835_v13 = vpop.permute.xlu1 %834  ;;  %2909 = vst [vmem:[#allocation24_spill] sm:$0xff] %v2504_v47 }
 0x24b   :  { %v842_v24 = vsel %vm158_vm2, %v833_v62, %v835_v13  ;;  %v841_v27 = vsel %vm158_vm2, %v835_v13, %v837_v7  ;;  %v826_v13 = vmul.f32 %v821_v49, %v2468_v34 }
 0x24c   :  { %v845_v28 = vmul.f32 %v842_v24, %v2442_v9  ;;  %v846_v56 = vmul.f32 %v841_v27, %v2453_v18 }
 0x24e   :  { %v857_v50 = vpop.permute.xlu0 %856  ;;  %v839_v54 = vpop.permute.xlu1 %838  ;;  %v2476_v55 = vpack.c.bf16 %v845_v28, %v825_v26  ;;  %v2496_v27 = vpack.c.bf16 %v846_v56, %v826_v13  ;;  %v2499_v28 = vrot.slane %v484_v33, %v2132_v16  ;;  %v2512_v56 = vrot.slane %v484_v33, %v2134_v17 }
 0x24f   :  { %v840_v6 = vsel %vm158_vm2, %v837_v7, %v839_v54  ;;  %v843_v5 = vsel %vm158_vm2, %v839_v54, %v833_v62 }
 0x250   :  { %v844_v42 = vmul.f32 %v843_v5, %v2458_v25  ;;  %v847_v3 = vmul.f32 %v840_v6, %v2465_v31  ;;  %1701 = vmatprep.subr.bf16.mxu0 %v2476_v55  ;;  %2908 = vst [vmem:[#allocation23_spill] sm:$0xff] %v2499_v28  ;;  %2910 = vst [vmem:[#allocation25_spill] sm:$0xff] %v2512_v56 }
 0x252   :  { %v2492_v24 = vpack.c.bf16 %v844_v42, %v824_v30  ;;  %v877_v7 = vpop.permute.xlu0 %876  ;;  %v855_v26 = vpop.permute.xlu1 %854  ;;  %v2494_v62 = vpack.c.bf16 %v847_v3, %v827_v8 }
 0x253   :  { %v862_v38 = vsel %vm202_vm3, %v853_v10, %v855_v26  ;;  %v861_v49 = vsel %vm202_vm3, %v855_v26, %v857_v50 }
 0x254   :  { %v865_v54 = vmul.f32 %v862_v38, %v2484_v63  ;;  %1703 = vmatpush1.bf16.msra.mxu0 %v2492_v24  ;;  %1737 = vmatprep.subr.bf16.mxu1 %v2494_v62  ;;  %v866_v8 = vmul.f32 %v861_v49, %v2499_v28 }
 0x255   :  { %1739 = vmatpush1.bf16.msra.mxu1 %v2496_v27 }
 0x256   :  { %v881_v6 = vpop.permute.xlu0 %880  ;;  %v859_v5 = vpop.permute.xlu1 %858  ;;  %v2516_v30 = vpack.c.bf16 %v2323_v21, %v865_v54  ;;  %v2533_v49 = vpack.c.bf16 %v2321_v20, %v866_v8 }
 0x257   :  { %v860_v42 = vsel %vm202_vm3, %v857_v50, %v859_v5  ;;  %v863_v3 = vsel %vm202_vm3, %v859_v5, %v853_v10  ;;  %v506_v10 = vld [vmem:[#allocation6 + $0x5] ss:$8 sm:$0xf]  ;;  %v528_v50 = vld [vmem:[#allocation6 + $0x6] ss:$8 sm:$0xf] }
 0x258   :  { %v864_v13 = vmul.f32 %v863_v3, %v2504_v47  ;;  %v867_v33 = vmul.f32 %v860_v42, %v2512_v56  ;;  %1705 = vmatprep.subr.bf16.mxu0 %v2516_v30  ;;  %v2542_v3 = vrot.slane %v506_v10, %v2127_v12  ;;  %v2548_v20 = vrot.slane %v528_v50, %v2127_v12 }
 0x259   :  { %v2558_v18 = vrot.slane %v506_v10, %v2134_v17  ;;  %v2565_v28 = vrot.slane %v528_v50, %v2132_v16  ;;  %v2568_v63 = vrot.slane %v528_v50, %v2134_v17 }
 0x25a   :  { %v2527_v26 = vpack.c.bf16 %v2319_v19, %v864_v13  ;;  %v897_v38 = vpop.permute.xlu0 %896  ;;  %v879_v21 = vpop.permute.xlu1 %878  ;;  %v2530_v54 = vpack.c.bf16 %v2325_v22, %v867_v33  ;;  %v2539_v19 = vrot.slane %v506_v10, %v2130_v15  ;;  %2912 = vst [vmem:[#allocation27_spill] sm:$0xff] %v2542_v3  ;;  %v2545_v22 = vrot.slane %v528_v50, %v2130_v15 }
 0x25b   :  { %2914 = vst [vmem:[#allocation29_spill] sm:$0xff] %v2548_v20  ;;  %v885_v8 = vsel %vm250_vm4, %v879_v21, %v881_v6  ;;  %v886_v13 = vsel %vm250_vm4, %v877_v7, %v879_v21  ;;  %v2555_v33 = vrot.slane %v506_v10, %v2132_v16  ;;  %2916 = vst [vmem:[#allocation31_spill] sm:$0xff] %v2558_v18 }
 0x25c   :  { %1707 = vmatpush1.bf16.msra.mxu0 %v2527_v26  ;;  %1741 = vmatprep.subr.bf16.mxu1 %v2530_v54  ;;  %2911 = vst [vmem:[#allocation26_spill] sm:$0xff] %v2539_v19  ;;  %2913 = vst [vmem:[#allocation28_spill] sm:$0xff] %v2545_v22  ;;  %v888_v21 = vmul.f32 %v886_v13, %v2539_v19  ;;  %v889_v9 = vmul.f32 %v885_v8, %v2542_v3 }
 0x25d   :  { %1743 = vmatpush1.bf16.msra.mxu1 %v2533_v49  ;;  %2915 = vst [vmem:[#allocation30_spill] sm:$0xff] %v2555_v33  ;;  %2917 = vst [vmem:[#allocation32_spill] sm:$0xff] %v2565_v28 }
 0x25e   :  { %v901_v5 = vpop.permute.xlu0 %900  ;;  %v883_v42 = vpop.permute.xlu1 %882  ;;  %2918 = vst [vmem:[#allocation33_spill] sm:$0xff] %v2568_v63 }
 0x25f   :  { %v884_v14 = vsel %vm250_vm4, %v881_v6, %v883_v42 }
 0x262   :  { %v917_v56 = vpop.permute.xlu0 %916  ;;  %v899_v47 = vpop.permute.xlu1 %898 }
 0x263   :  { %v905_v31 = vsel %vm294_vm6, %v899_v47, %v901_v5  ;;  %v906_v25 = vsel %vm294_vm6, %v897_v38, %v899_v47  ;;  %v887_v47 = vsel %vm250_vm4, %v883_v42, %v877_v7 }
 0x264   :  { %v908_v10 = vmul.f32 %v906_v25, %v2545_v22  ;;  %v909_v32 = vmul.f32 %v905_v31, %v2548_v20  ;;  %v890_v31 = vmul.f32 %v884_v14, %v2555_v33  ;;  %v891_v8 = vmul.f32 %v887_v47, %v2558_v18  ;;  %v572_v14 = vld [vmem:[#allocation6 + $0x20] ss:$8 sm:$0xf] }
 0x265   :  { %v2605_v47 = vrot.slane %v572_v14, %v2130_v15  ;;  %v2628_v20 = vrot.slane %v572_v14, %v2134_v17 }
 0x266   :  { %v2578_v0 = vpack.c.bf16 %v908_v10, %v888_v21  ;;  %v921_v41 = vpop.permute.xlu0 %920  ;;  %v903_v39 = vpop.permute.xlu1 %902  ;;  %v2580_v50 = vpack.c.bf16 %v909_v32, %v889_v9 }
 0x267   :  { %v904_v13 = vsel %vm294_vm6, %v901_v5, %v903_v39  ;;  %v907_v25 = vsel %vm294_vm6, %v903_v39, %v897_v38  ;;  %v550_v39 = vld [vmem:[#allocation6 + $0x7] ss:$8 sm:$0xf] }
 0x268   :  { %v910_v6 = vmul.f32 %v904_v13, %v2565_v28  ;;  %v911_v7 = vmul.f32 %v907_v25, %v2568_v63  ;;  %1709 = vmatprep.subr.bf16.mxu0 %v2580_v50  ;;  %v2599_v21 = vrot.slane %v550_v39, %v2130_v15  ;;  %v2602_v10 = vrot.slane %v550_v39, %v2127_v12 }
 0x269   :  { %1711 = vmatpush1.bf16.msra.mxu0 %v2578_v0  ;;  %v2608_v13 = vrot.slane %v572_v14, %v2127_v12  ;;  %v2625_v28 = vrot.slane %v572_v14, %v2132_v16 }
 0x26a   :  { %v2592_v32 = vpack.c.bf16 %v910_v6, %v890_v31  ;;  %v919_v9 = vpop.permute.xlu1 %918  ;;  %v2594_v42 = vpack.c.bf16 %v911_v7, %v891_v8  ;;  %v937_v5 = vpop.permute.xlu0 %936  ;;  %v2615_v6 = vrot.slane %v550_v39, %v2132_v16  ;;  %v2618_v7 = vrot.slane %v550_v39, %v2134_v17 }
 0x26b   :  { %v925_v25 = vsel %vm338_vm5, %v919_v9, %v921_v41  ;;  %v926_v31 = vsel %vm338_vm5, %v917_v56, %v919_v9 }
 0x26c   :  { %1745 = vmatprep.subr.bf16.mxu1 %v2594_v42  ;;  %v928_v9 = vmul.f32 %v926_v31, %v2599_v21  ;;  %v929_v22 = vmul.f32 %v925_v25, %v2602_v10 }
 0x26d   :  { %1747 = vmatpush1.bf16.msra.mxu1 %v2592_v32 }
 0x26e   :  { %v923_v38 = vpop.permute.xlu1 %922  ;;  %v941_v8 = vpop.permute.xlu0 %940 }
 0x26f   :  { %v924_v33 = vsel %vm338_vm5, %v921_v41, %v923_v38 }
 0x270   :  { %v930_v25 = vmul.f32 %v924_v33, %v2615_v6 }
 0x272   :  { %v939_v63 = vpop.permute.xlu1 %938 }
 0x273   :  { %v945_v15 = vsel %vm382_vm7, %v939_v63, %v941_v8  ;;  %v946_v12 = vsel %vm382_vm7, %v937_v5, %v939_v63  ;;  %v927_v63 = vsel %vm338_vm5, %v923_v38, %v917_v56  ;;  %v956_v56 = vld [vmem:[#allocation8 + $0x10] sm:$0xff] }
 0x274   :  { %v948_v39 = vmul.f32 %v946_v12, %v2605_v47  ;;  %v949_v18 = vmul.f32 %v945_v15, %v2608_v13  ;;  %v931_v31 = vmul.f32 %v927_v63, %v2618_v7  ;;  %v2923_v63 = vld [vmem:[#allocation13_spill] sm:$0xff] }
 0x276   :  { %v1714_v3 = vpack.c.bf16 %v948_v39, %v928_v9  ;;  %v943_v16 = vpop.permute.xlu1 %942  ;;  %v1712_v19 = vpack.c.bf16 %v949_v18, %v929_v22  ;;  %v2922_v9 = vld [vmem:[#allocation18_spill] sm:$0xff] }
 0x277   :  { %v944_v17 = vsel %vm382_vm7, %v941_v8, %v943_v16  ;;  %v947_v14 = vsel %vm382_vm7, %v943_v16, %v937_v5  ;;  %v2921_v8 = vld [vmem:[#allocation17_spill] sm:$0xff] }
 0x278   :  { %v950_v15 = vmul.f32 %v944_v17, %v2625_v28  ;;  %v951_v41 = vmul.f32 %v947_v14, %v2628_v20  ;;  %1713 = vmatprep.subr.bf16.mxu0 %v1712_v19 }
 0x279   :  { %1715 = vmatpush1.bf16.msra.mxu0 %v1714_v3 }
 0x27a   :  { %v1750_v38 = vpack.c.bf16 %v950_v15, %v930_v25  ;;  %1753 = vmatprep.subr.bf16.mxu0 %v2155_v40  ;;  %v1748_v18 = vpack.c.bf16 %v951_v41, %v931_v31 }
 0x27c   :  { %1105 = vmatmul.mubr.f32.vlgmr.msra.gmra.mrb[2].mxu0 %v956_v56  ;;  %1749 = vmatprep.subr.bf16.mxu1 %v1748_v18 }
 0x27d   :  { %1751 = vmatpush1.bf16.msra.mxu1 %v1750_v38  ;;  %1755 = vmatpush1.bf16.msra.mxu0 %v2164_v51 }
 0x27e   :  { %1757 = vmatprep.subr.bf16.mxu0 %v2193_v23  ;;  %1805 = vmatprep.subr.bf16.mxu1 %v2166_v52 }
 0x27f   :  { %v1034_v40 = vpop.permute.xlu0 %1033 }
 0x280   :  { %1176 = vmatmul.mubr.f32.vlgmr.msra.gmra.mrb[2].mxu1 %v956_v56 }
 0x281   :  { %1759 = vmatpush1.bf16.msra.mxu0 %v2203_v35  ;;  %1807 = vmatpush1.bf16.msra.mxu1 %v2168_v53 }
 0x282   :  { %1761 = vmatprep.subr.bf16.mxu0 %v2225_v58  ;;  %1809 = vmatprep.subr.bf16.mxu1 %v2205_v36 }
 0x285   :  { %1763 = vmatpush1.bf16.msra.mxu0 %v2234_v61  ;;  %1811 = vmatpush1.bf16.msra.mxu1 %v2207_v37 }
 0x286   :  { %1765 = vmatprep.subr.bf16.mxu0 %v2266_v43  ;;  %1813 = vmatprep.subr.bf16.mxu1 %v2228_v59 }
 0x289   :  { %1767 = vmatpush1.bf16.msra.mxu0 %v2273_v46  ;;  %1815 = vmatpush1.bf16.msra.mxu1 %v2231_v60 }
 0x28a   :  { %1769 = vmatprep.subr.bf16.mxu0 %v2416_v48  ;;  %1817 = vmatprep.subr.bf16.mxu1 %v2268_v44  ;;  %v1355_v44 = vld [vmem:[#allocation8 + $0x28] sm:$0xff] }
 0x28b   :  { %1646 = vmatprep.mubr.msk.f32.mxu0 %vm1470_vm10, %v1355_v44  ;;  %1647 = vmatprep.mubr.msk.f32.mxu1 %vm1470_vm10, %v1355_v44 }
 0x28d   :  { %1771 = vmatpush1.bf16.msra.mxu0 %v2427_v57  ;;  %1819 = vmatpush1.bf16.msra.mxu1 %v2270_v45  ;;  %v1356_v45 = vld [vmem:[%s2875_s3 + $0x10] sm:$0xff]  ;;  %s1985_s3 = smov [#allocation9]  }
 0x28e   :  { %1773 = vmatprep.subr.bf16.mxu0 %v2476_v55  ;;  %1821 = vmatprep.subr.bf16.mxu1 %v2430_v4  ;;  %s1629_s13 = sshll.u32 %s1985_s3, 4  ;;  %s1630_s13 = int_to_ptr.vmem [resolvable:$true] %s1629_s13 }
 0x28f   :  { %s1941_s1 = scalar_lea.vmem %s1630_s13, 1536  ;;  %p1946_p11 = scmp.lt.s32.totalorder %s1630_s13, %s1630_s13 }
 0x290   :  { %p1942_p10 = scmp.ne.s32.totalorder %s1630_s13, %s1941_s1  ;;  %p1947_p12 = scmp.lt.s32.totalorder %s1941_s1, %s1941_s1 }
 0x291   :  { %1775 = vmatpush1.bf16.msra.mxu0 %v2492_v24  ;;  %1823 = vmatpush1.bf16.msra.mxu1 %v2433_v2 }
 0x292   :  { %1777 = vmatprep.subr.bf16.mxu0 %v2516_v30  ;;  %1825 = vmatprep.subr.bf16.mxu1 %v2494_v62  ;;  %p1948_p13 = por %p1947_p12, %p1946_p11 }
 0x294   :  { %p1949_p0 = pnand %p1948_p13, %p1942_p10 }
 0x295   :  { %1779 = vmatpush1.bf16.msra.mxu0 %v2527_v26  ;;  %1827 = vmatpush1.bf16.msra.mxu1 %v2496_v27 }
 0x296   :  { %1781 = vmatprep.subr.bf16.mxu0 %v2580_v50  ;;  %1829 = vmatprep.subr.bf16.mxu1 %v2530_v54  ;;  %v2919_v50 = vld [vmem:[#allocation14_spill] sm:$0xff] }
 0x299   :  { %1783 = vmatpush1.bf16.msra.mxu0 %v2578_v0  ;;  %1831 = vmatpush1.bf16.msra.mxu1 %v2533_v49 }
 0x29a   :  { %1785 = vmatprep.subr.bf16.mxu0 %v1712_v19  ;;  %1833 = vmatprep.subr.bf16.mxu1 %v2594_v42  ;;  %v2920_v42 = vld [vmem:[#allocation15_spill] sm:$0xff] }
 0x29d   :  { %1787 = vmatpush1.bf16.msra.mxu0 %v1714_v3  ;;  %1835 = vmatpush1.bf16.msra.mxu1 %v2592_v32 }
 0x29e   :  { %1837 = vmatprep.subr.bf16.mxu1 %v1748_v18 }
 0x2a1   :  { %1839 = vmatpush1.bf16.msra.mxu1 %v1750_v38 }
 0x34f   :  { %v1106_v51 = vpop.f32.mrb[2].mxu0 }
 0x350   :  { %v1107_v52 = vadd.f32 %v1106_v51, %v1034_v40  ;;  %v1108_v53 = vpop.f32.mrb[3].mxu0  ;;  %v2924_v51 = vld [vmem:[#allocation16_spill] sm:$0xff] }
 0x351   :  { %v1109_v23 = vadd.f32 %v1108_v53, %v1034_v40  ;;  %v2925_v53 = vld [vmem:[#allocation22_spill] sm:$0xff] }
 0x352   :  { %v2678_v35 = vmax.f32 %v1107_v52, 0.0 }
 0x353   :  { %v2680_v36 = vmax.f32 %v1109_v23, 0.0  ;;  %v1177_v37 = vpop.f32.mrb[2].mxu1 }
 0x354   :  { %1186 = vst [vmem:[#allocation9 + $0x10] sm:$0xff] %v2678_v35  ;;  %v1178_v58 = vadd.f32 %v1177_v37, %v1034_v40  ;;  %1190 = vrot.lane.b32.xlu1 %v2678_v35, %s1976_s27  ;;  %v1179_v59 = vpop.f32.mrb[3].mxu1 }
 0x355   :  { %1187 = vst [vmem:[#allocation9 + $0x18] sm:$0xff] %v2680_v36  ;;  %v1180_v60 = vadd.f32 %v1179_v59, %v1034_v40  ;;  %1192 = vrot.lane.b32.xlu0 %v2680_v36, %s1976_s27 }
 0x356   :  { %v2688_v61 = vmax.f32 %v1178_v58, 0.0 }
 0x357   :  { %v2690_v43 = vmax.f32 %v1180_v60, 0.0 }
 0x358   :  { %1188 = vst [vmem:[#allocation9 + $0x40] sm:$0xff] %v2688_v61  ;;  %1194 = vrot.lane.b32.xlu1 %v2688_v61, %s1976_s27 }
 0x359   :  { %1189 = vst [vmem:[#allocation9 + $0x48] sm:$0xff] %v2690_v43  ;;  %1196 = vrot.lane.b32.xlu0 %v2690_v43, %s1976_s27 }
 0x35c   :  { %1210 = vrot.lane.b32.xlu1 %v2678_v35, %s1975_s24 }
 0x35d   :  { %1212 = vrot.lane.b32.xlu0 %v2680_v36, %s1975_s24 }
 0x360   :  { %1214 = vrot.lane.b32.xlu1 %v2688_v61, %s1975_s24 }
 0x361   :  { %1216 = vrot.lane.b32.xlu0 %v2690_v43, %s1975_s24 }
 0x364   :  { %1230 = vrot.lane.b32.xlu1 %v2678_v35, %s1977_s2 }
 0x365   :  { %1232 = vrot.lane.b32.xlu0 %v2680_v36, %s1977_s2 }
 0x368   :  { %1234 = vrot.lane.b32.xlu1 %v2688_v61, %s1977_s2 }
 0x369   :  { %1236 = vrot.lane.b32.xlu0 %v2690_v43, %s1977_s2 }
 0x36c   :  { %1250 = vrot.lane.b32.xlu1 %v2678_v35, %s1978_s28 }
 0x36d   :  { %1252 = vrot.lane.b32.xlu0 %v2680_v36, %s1978_s28 }
 0x370   :  { %1254 = vrot.lane.b32.xlu1 %v2688_v61, %s1978_s28 }
 0x371   :  { %1256 = vrot.lane.b32.xlu0 %v2690_v43, %s1978_s28 }
 0x374   :  { %1274 = vrot.lane.b32.xlu1 %v2678_v35, %s1979_s29 }
 0x375   :  { %1276 = vrot.lane.b32.xlu0 %v2680_v36, %s1979_s29 }
 0x378   :  { %1278 = vrot.lane.b32.xlu1 %v2688_v61, %s1979_s29 }
 0x379   :  { %1280 = vrot.lane.b32.xlu0 %v2690_v43, %s1979_s29 }
 0x37c   :  { %1294 = vrot.lane.b32.xlu1 %v2678_v35, %s1980_s30 }
 0x37d   :  { %1296 = vrot.lane.b32.xlu0 %v2680_v36, %s1980_s30 }
 0x380   :  { %1298 = vrot.lane.b32.xlu1 %v2688_v61, %s1980_s30 }
 0x381   :  { %1300 = vrot.lane.b32.xlu0 %v2690_v43, %s1980_s30 }
 0x384   :  { %1314 = vrot.lane.b32.xlu1 %v2678_v35, %s1981_s5 }
 0x385   :  { %1316 = vrot.lane.b32.xlu0 %v2680_v36, %s1981_s5 }
 0x388   :  { %1318 = vrot.lane.b32.xlu1 %v2688_v61, %s1981_s5 }
 0x389   :  { %1320 = vrot.lane.b32.xlu0 %v2690_v43, %s1981_s5 }
 0x38c   :  { %1334 = vrot.lane.b32.xlu1 %v2678_v35, %s1983_s6 }
 0x38d   :  { %1336 = vrot.lane.b32.xlu0 %v2680_v36, %s1983_s6 }
 0x390   :  { %1338 = vrot.lane.b32.xlu1 %v2688_v61, %s1983_s6 }
 0x391   :  { %1340 = vrot.lane.b32.xlu0 %v2690_v43, %s1983_s6 }
 0x394   :  { %1467 = vperm.xlu1 %1874, %v1356_v45  }
 0x3c6   :  { %v1191_v46 = vpop.permute.xlu1 %1190 }
 0x3c7   :  { %v1193_v48 = vpop.permute.xlu0 %1192 }
 0x3c8   :  { %v1200_v2 = vsel %vm71_vm0, %v1191_v46, %v1193_v48 }
 0x3c9   :  { %v1203_v62 = vmul.f32 %v1200_v2, %v2399_v29 }
 0x3ca   :  { %v1195_v57 = vpop.permute.xlu1 %1194 }
 0x3cb   :  { %v1197_v4 = vpop.permute.xlu0 %1196  ;;  %v1199_v49 = vsel %vm71_vm0, %v1193_v48, %v1195_v57  ;;  %v2926_v48 = vld [vmem:[#allocation23_spill] sm:$0xff] }
 0x3cc   :  { %v1198_v30 = vsel %vm71_vm0, %v1195_v57, %v1197_v4  ;;  %v1201_v26 = vsel %vm71_vm0, %v1197_v4, %v1191_v46  ;;  %v1204_v16 = vmul.f32 %v1199_v49, %v2923_v63  ;;  %v2931_v49 = vld [vmem:[#allocation19_spill] sm:$0xff] }
 0x3cd   :  { %v1202_v32 = vmul.f32 %v1201_v26, %v2919_v50  ;;  %v1205_v5 = vmul.f32 %v1198_v30, %v2920_v42  ;;  %v2930_v26 = vld [vmem:[#allocation25_spill] sm:$0xff]  ;;  %v2932_v42 = vld [vmem:[#allocation26_spill] sm:$0xff] }
 0x3ce   :  { %v1211_v0 = vpop.permute.xlu1 %1210 }
 0x3cf   :  { %v1213_v55 = vpop.permute.xlu0 %1212 }
 0x3d0   :  { %v1220_v24 = vsel %vm114_vm1, %v1211_v0, %v1213_v55 }
 0x3d1   :  { %v1223_v27 = vmul.f32 %v1220_v24, %v2439_v1  ;;  %v2928_v24 = vld [vmem:[#allocation21_spill] sm:$0xff] }
 0x3d2   :  { %v1215_v54 = vpop.permute.xlu1 %1214 }
 0x3d3   :  { %v1219_v19 = vsel %vm114_vm1, %v1213_v55, %v1215_v54  ;;  %v1217_v3 = vpop.permute.xlu0 %1216  ;;  %v1788_v22 = vpack.c.bf16 %v1223_v27, %v1203_v62  ;;  %v2929_v27 = vld [vmem:[#allocation24_spill] sm:$0xff] }
 0x3d4   :  { %v1224_v33 = vmul.f32 %v1219_v19, %v2468_v34  ;;  %v1218_v29 = vsel %vm114_vm1, %v1215_v54, %v1217_v3  ;;  %v1221_v1 = vsel %vm114_vm1, %v1217_v3, %v1211_v0  ;;  %v2927_v0 = vld [vmem:[#allocation20_spill] sm:$0xff] }
 0x3d5   :  { %v1222_v12 = vmul.f32 %v1221_v1, %v2921_v8  ;;  %v1225_v39 = vmul.f32 %v1218_v29, %v2922_v9  ;;  %1789 = vmatprep.subr.bf16.mxu0 %v1788_v22  ;;  %v2933_v9 = vld [vmem:[#allocation27_spill] sm:$0xff] }
 0x3d6   :  { %v1231_v17 = vpop.permute.xlu1 %1230  ;;  %v1842_v31 = vpack.c.bf16 %v1224_v33, %v1204_v16 }
 0x3d7   :  { %v1790_v14 = vpack.c.bf16 %v1222_v12, %v1202_v32  ;;  %v1233_v34 = vpop.permute.xlu0 %1232  ;;  %v1840_v25 = vpack.c.bf16 %v1225_v39, %v1205_v5 }
 0x3d8   :  { %v1240_v56 = vsel %vm158_vm2, %v1231_v17, %v1233_v34 }
 0x3d9   :  { %1791 = vmatpush1.bf16.msra.mxu0 %v1790_v14  ;;  %1841 = vmatprep.subr.bf16.mxu1 %v1840_v25  ;;  %v1243_v52 = vmul.f32 %v1240_v56, %v2924_v51 }
 0x3da   :  { %1843 = vmatpush1.bf16.msra.mxu1 %v1842_v31  ;;  %v1235_v15 = vpop.permute.xlu1 %1234 }
 0x3db   :  { %v1237_v41 = vpop.permute.xlu0 %1236  ;;  %v1239_v60 = vsel %vm158_vm2, %v1233_v34, %v1235_v15  ;;  %v2935_v34 = vld [vmem:[#allocation31_spill] sm:$0xff] }
 0x3dc   :  { %v1238_v37 = vsel %vm158_vm2, %v1235_v15, %v1237_v41  ;;  %v1241_v58 = vsel %vm158_vm2, %v1237_v41, %v1231_v17  ;;  %v1244_v19 = vmul.f32 %v1239_v60, %v2931_v49  ;;  %v2934_v17 = vld [vmem:[#allocation30_spill] sm:$0xff] }
 0x3dd   :  { %v1242_v55 = vmul.f32 %v1241_v58, %v2927_v0  ;;  %v1245_v62 = vmul.f32 %v1238_v37, %v2928_v24  ;;  %v2936_v58 = vld [vmem:[#allocation28_spill] sm:$0xff]  ;;  %v2939_v24 = vld [vmem:[#allocation33_spill] sm:$0xff] }
 0x3de   :  { %v1251_v38 = vpop.permute.xlu1 %1250  ;;  %v2938_v0 = vld [vmem:[#allocation32_spill] sm:$0xff] }
 0x3df   :  { %v1253_v18 = vpop.permute.xlu0 %1252 }
 0x3e0   :  { %v1260_v40 = vsel %vm202_vm3, %v1251_v38, %v1253_v18 }
 0x3e1   :  { %v1263_v23 = vmul.f32 %v1260_v40, %v2925_v53 }
 0x3e2   :  { %v1255_v59 = vpop.permute.xlu1 %1254 }
 0x3e3   :  { %v1259_v44 = vsel %vm202_vm3, %v1253_v18, %v1255_v59  ;;  %v1257_v45 = vpop.permute.xlu0 %1256  ;;  %v1792_v46 = vpack.c.bf16 %v1263_v23, %v1243_v52 }
 0x3e4   :  { %v1264_v57 = vmul.f32 %v1259_v44, %v2926_v48  ;;  %v1258_v4 = vsel %vm202_vm3, %v1255_v59, %v1257_v45  ;;  %v1261_v2 = vsel %vm202_vm3, %v1257_v45, %v1251_v38 }
 0x3e5   :  { %v1262_v30 = vmul.f32 %v1261_v2, %v2929_v27  ;;  %v1265_v54 = vmul.f32 %v1258_v4, %v2930_v26  ;;  %1793 = vmatprep.subr.bf16.mxu0 %v1792_v46  ;;  %v2937_v46 = vld [vmem:[#allocation29_spill] sm:$0xff] }
 0x3e6   :  { %v1275_v3 = vpop.permute.xlu1 %1274  ;;  %v1846_v1 = vpack.c.bf16 %v1264_v57, %v1244_v19 }
 0x3e7   :  { %v1794_v22 = vpack.c.bf16 %v1262_v30, %v1242_v55  ;;  %v1277_v33 = vpop.permute.xlu0 %1276  ;;  %v1844_v29 = vpack.c.bf16 %v1265_v54, %v1245_v62 }
 0x3e8   :  { %v1284_v50 = vsel %vm250_vm4, %v1275_v3, %v1277_v33 }
 0x3e9   :  { %1795 = vmatpush1.bf16.msra.mxu0 %v1794_v22  ;;  %1845 = vmatprep.subr.bf16.mxu1 %v1844_v29  ;;  %v1286_v5 = vmul.f32 %v1284_v50, %v2932_v42 }
 0x3ea   :  { %1847 = vmatpush1.bf16.msra.mxu1 %v1846_v1  ;;  %v1279_v32 = vpop.permute.xlu1 %1278 }
 0x3eb   :  { %v1283_v8 = vsel %vm250_vm4, %v1277_v33, %v1279_v32  ;;  %v1281_v12 = vpop.permute.xlu0 %1280  ;;  %v1798_v41 = vpack.c.bf16 %v1286_v5, %v2678_v35  ;;  %v1354_v5 = vld [vmem:[#allocation8 + $0x20] sm:$0xff] }
 0x3ec   :  { %v1287_v39 = vmul.f32 %v1283_v8, %v2933_v9  ;;  %v1282_v63 = vsel %vm250_vm4, %v1279_v32, %v1281_v12  ;;  %v1285_v16 = vsel %vm250_vm4, %v1281_v12, %v1275_v3 }
 0x3ed   :  { %v1288_v14 = vmul.f32 %v1282_v63, %v2934_v17  ;;  %v1289_v25 = vmul.f32 %v1285_v16, %v2935_v34 }
 0x3ee   :  { %v1295_v31 = vpop.permute.xlu1 %1294  ;;  %v1796_v15 = vpack.c.bf16 %v1287_v39, %v2680_v36 }
 0x3ef   :  { %v1850_v56 = vpack.c.bf16 %v1288_v14, %v2688_v61  ;;  %v1297_v38 = vpop.permute.xlu0 %1296  ;;  %v1848_v18 = vpack.c.bf16 %v1289_v25, %v2690_v43 }
 0x3f0   :  { %1797 = vmatprep.subr.bf16.mxu0 %v1796_v15  ;;  %v1304_v23 = vsel %vm294_vm6, %v1295_v31, %v1297_v38 }
 0x3f1   :  { %1799 = vmatpush1.bf16.msra.mxu0 %v1798_v41  ;;  %1849 = vmatprep.subr.bf16.mxu1 %v1848_v18  ;;  %v1306_v59 = vmul.f32 %v1304_v23, %v2936_v58 }
 0x3f2   :  { %1851 = vmatpush1.bf16.msra.mxu1 %v1850_v56  ;;  %v1299_v40 = vpop.permute.xlu1 %1298 }
 0x3f3   :  { %v1301_v51 = vpop.permute.xlu0 %1300  ;;  %v1303_v35 = vsel %vm294_vm6, %v1297_v38, %v1299_v40 }
 0x3f4   :  { %v1302_v61 = vsel %vm294_vm6, %v1299_v40, %v1301_v51  ;;  %v1305_v43 = vsel %vm294_vm6, %v1301_v51, %v1295_v31  ;;  %v1307_v48 = vmul.f32 %v1303_v35, %v2937_v46 }
 0x3f5   :  { %v1308_v55 = vmul.f32 %v1302_v61, %v2938_v0  ;;  %v1309_v62 = vmul.f32 %v1305_v43, %v2939_v24 }
 0x3f6   :  { %v1315_v52 = vpop.permute.xlu1 %1314 }
 0x3f7   :  { %v1317_v53 = vpop.permute.xlu0 %1316 }
 0x3f8   :  { %v1324_v36 = vsel %vm338_vm5, %v1315_v52, %v1317_v53 }
 0x3f9   :  { %v1326_v60 = vmul.f32 %v1324_v36, %v2599_v21 }
 0x3fa   :  { %v1319_v37 = vpop.permute.xlu1 %1318 }
 0x3fb   :  { %v1323_v44 = vsel %vm338_vm5, %v1317_v53, %v1319_v37  ;;  %v1321_v45 = vpop.permute.xlu0 %1320  ;;  %v1802_v54 = vpack.c.bf16 %v1326_v60, %v1306_v59 }
 0x3fc   :  { %v1327_v57 = vmul.f32 %v1323_v44, %v2602_v10  ;;  %v1322_v4 = vsel %vm338_vm5, %v1319_v37, %v1321_v45  ;;  %v1325_v2 = vsel %vm338_vm5, %v1321_v45, %v1315_v52 }
 0x3fd   :  { %v1328_v21 = vmul.f32 %v1322_v4, %v2615_v6  ;;  %v1329_v27 = vmul.f32 %v1325_v2, %v2618_v7 }
 0x3fe   :  { %v1335_v30 = vpop.permute.xlu1 %1334  ;;  %v1800_v26 = vpack.c.bf16 %v1327_v57, %v1307_v48 }
 0x3ff   :  { %v1854_v49 = vpack.c.bf16 %v1328_v21, %v1308_v55  ;;  %v1337_v19 = vpop.permute.xlu0 %1336  ;;  %v1852_v10 = vpack.c.bf16 %v1329_v27, %v1309_v62 }
 0x400   :  { %1801 = vmatprep.subr.bf16.mxu0 %v1800_v26  ;;  %v1344_v3 = vsel %vm382_vm7, %v1335_v30, %v1337_v19 }
 0x401   :  { %1803 = vmatpush1.bf16.msra.mxu0 %v1802_v54  ;;  %1853 = vmatprep.subr.bf16.mxu1 %v1852_v10  ;;  %v1346_v50 = vmul.f32 %v1344_v3, %v2605_v47 }
 0x402   :  { %1855 = vmatpush1.bf16.msra.mxu1 %v1854_v49  ;;  %v1339_v22 = vpop.permute.xlu1 %1338 }
 0x403   :  { %v1343_v33 = vsel %vm382_vm7, %v1337_v19, %v1339_v22  ;;  %v1341_v6 = vpop.permute.xlu0 %1340 }
 0x404   :  { %v1347_v7 = vmul.f32 %v1343_v33, %v2608_v13  ;;  %v1342_v29 = vsel %vm382_vm7, %v1339_v22, %v1341_v6  ;;  %v1345_v1 = vsel %vm382_vm7, %v1341_v6, %v1335_v30 }
 0x405   :  { %v1348_v32 = vmul.f32 %v1342_v29, %v2625_v28  ;;  %v1349_v42 = vmul.f32 %v1345_v1, %v2628_v20 }
 0x406   :  { %1526 = vmatprep.subr.mxu0 %v1347_v7 }
 0x407   :  { %1527 = vmatpush1.msra.mxu0 %v1346_v50  ;;  %1597 = vmatprep.subr.mxu1 %v1349_v42 }
 0x408   :  { %1539 = vmatmul.mubr.f32.vlgmr.msra.gmra.mrb[4].mxu0 %v1354_v5  ;;  %1598 = vmatpush1.msra.mxu1 %v1348_v32 }
 0x409   :  { %1610 = vmatmul.mubr.f32.vlgmr.msra.gmra.mrb[4].mxu1 %v1354_v5 }
 0x413   :  { %v1468_v13 = vpop.permute.xlu1 %1467 }
 0x4db   :  { %v1540_v8 = vpop.f32.mrb[4].mxu0 }
 0x4dc   :  { %v1542_v12 = vpop.f32.mrb[5].mxu0  ;;  %v1611_v9 = vpop.f32.mrb[4].mxu1  ;;  %v1541_v39 = vadd.f32 %v1540_v8, %v1468_v13 }
 0x4dd   :  { %v1543_v11 = vadd.f32 %v1542_v12, %v1468_v13  ;;  %v1612_v63 = vadd.f32 %v1611_v9, %v1468_v13  ;;  %v1613_v16 = vpop.f32.mrb[5].mxu1 }
 0x4de   :  { %v1616_v28 = vmax.f32 %v1541_v39, 0.0  ;;  %v1614_v47 = vadd.f32 %v1613_v16, %v1468_v13 }
 0x4df   :  { %v1617_v20 = vmax.f32 %v1543_v11, 0.0  ;;  %v1618_v17 = vmax.f32 %v1612_v63, 0.0 }
 0x4e0   :  { %1620 = vst [vmem:[#allocation9 + $0x20] sm:$0xff] %v1616_v28  ;;  %v1619_v14 = vmax.f32 %v1614_v47, 0.0 }
 0x4e1   :  { %1621 = vst [vmem:[#allocation9 + $0x28] sm:$0xff] %v1617_v20  ;;  %1622 = vst [vmem:[#allocation9 + $0x50] sm:$0xff] %v1618_v17 }
 0x4e2   :  { %1623 = vst [vmem:[#allocation9 + $0x58] sm:$0xff] %v1619_v14 }
 0x4e3   :  { %1952 = shalt.err (!%p1949_p0)
}
 0x4e4   :  { %s1953_s16 = scalar_lea.hbm %s2876_s4, 1536 }
 0x4e5   :  { %p1954_p1 = scmp.ne.s32.totalorder %s2876_s4, %s1953_s16  ;;  %p1957_p2 = scmp.lt.u32.totalorder %s1953_s16, %s2876_s4 }
 0x4e7   :  { %p1959_p3 = pnand %p1957_p2, %p1954_p1 }
 0x4e9   :  { %1962 = shalt.err (!%p1959_p3)
}
 0x4ea   :  { %1635 = dma.vmem_to_hbm [thread:$0]  %s1630_s13, 1536, %s2876_s4, [#allocation5], %s1974_s0, %s1974_s0, %s1975_s24  }
 0x4eb   :  { %1967 = dma.done.wait [#allocation5], 1536  }
 0x4ec   :  { %1968 = vsyncadd [#allocation5], 4294965760 }
 0x4ed   :  { %1639 = vsyncpa [#allocation4], 1 }
 0x4ee   :  { %1640 = vsyncpa [#allocation7], 1 }
 0x4ef   :  { %1641 = vsyncpa [#allocation5], 1 }

</bundles_post_ra>
